<compile_context>
chip_gen: v7x
topology: tpu7x:2x2x1
jax: 0.10.0
libtpu: 0.0.40
codegen_flags: <defaults>
</compile_context>

<pallas_src>
import jax
import jax.numpy as jnp
from jax import lax
from jax.experimental import pallas as pl
from jax.experimental.pallas import tpu as pltpu


def _round_up(x, m):
    return (x + m - 1) // m * m


def _ngram_kernel(ids_ref,    # VMEM (Bt, C)    int32  token ids for this tile
                  tab_ref,    # VMEM (C*V, H)   f32    folded emb@w1^T tables
                  b1_ref,     # VMEM (1, H)     f32
                  w2t_ref,    # VMEM (H, Vp)    f32    linear2.weight.T (V padded)
                  b2_ref,     # VMEM (1, Vp)    f32    (padding = -1e30)
                  out_ref):   # VMEM (Bt, Vp)   f32    log-probs tile
    Bt, C = ids_ref.shape
    CV, H = tab_ref.shape
    V = CV // C

    # --- Embedding + linear1 fused as a one-hot @ table MXU matmul ----------
    # Flattened one-hot over (context position, vocab id): column j*V + v is 1
    # iff ids[r, j] == v.  Column ranges per j are disjoint, so summing the
    # per-position one-hots is exact.  Built with C (=2) vectorized compares.
    col = lax.broadcasted_iota(jnp.int32, (Bt, CV), 1)
    onehot = (col == ids_ref[:, pl.ds(0, 1)]).astype(jnp.float32)
    for j in range(1, C):                       # C is tiny & static -> unrolled
        onehot = onehot + (
            col == (ids_ref[:, pl.ds(j, 1)] + j * V)).astype(jnp.float32)

    h = jnp.dot(onehot, tab_ref[...], preferred_element_type=jnp.float32)
    h = jnp.maximum(h + b1_ref[...], 0.0)

    # --- linear2: (Bt, H) @ (H, Vp) ------------------------------------------
    logits = jnp.dot(h, w2t_ref[...], preferred_element_type=jnp.float32) + b2_ref[...]

    # --- log_softmax over the vocab axis (padded cols have logit ~ -1e30,
    #     exp(...) == 0, so the result is exact for real cols) ----------------
    m = jnp.max(logits, axis=1, keepdims=True)
    lse = jnp.log(jnp.sum(jnp.exp(logits - m), axis=1, keepdims=True)) + m
    out_ref[...] = logits - lse


def ngram_forward(inputs, emb_w, w1, b1, w2, b2, *, block_b=256):
    """Batched NGramLanguageModeler forward.

    inputs: (B, C) int32 token ids (or (C,) for the original single-context
            module semantics -> returns (1, V)).
    Returns (B, V) float32 log-probabilities.
    """
    inputs = jnp.asarray(inputs, jnp.int32)
    single = inputs.ndim == 1
    if single:
        inputs = inputs[None, :]

    B, C = inputs.shape
    emb_w = jnp.asarray(emb_w, jnp.float32)
    w1 = jnp.asarray(w1, jnp.float32)
    b1 = jnp.asarray(b1, jnp.float32)
    w2 = jnp.asarray(w2, jnp.float32)
    b2 = jnp.asarray(b2, jnp.float32)

    V, E = emb_w.shape
    H = w1.shape[0]
    assert w1.shape == (H, C * E)
    assert w2.shape == (V, H)

    # Lane-dense vocab padding and batch-tile padding.
    Vp = _round_up(V, 128)
    Bt = min(block_b, _round_up(B, 8))
    B_pad = _round_up(B, Bt)

    ids = jnp.pad(inputs, ((0, B_pad - B), (0, 0)))                      # (B_pad, C)

    # Fold embedding + linear1 (weight-only precompute):
    #   tab[j*V + v, :] = emb_w[v, :] @ w1.T[j*E:(j+1)*E, :]
    w1t_blocks = w1.T.reshape(C, E, H)                                    # (C, E, H)
    tab = jnp.einsum('ve,jeh->jvh', emb_w, w1t_blocks).reshape(C * V, H)  # (C*V, H)

    b1r = b1.reshape(1, H)
    w2t = jnp.pad(w2.T, ((0, 0), (0, Vp - V)))                            # (H, Vp)
    b2r = jnp.pad(b2.reshape(1, V), ((0, 0), (0, Vp - V)),
                  constant_values=-1e30)                                  # (1, Vp)

    grid = (B_pad // Bt,)

    out = pl.pallas_call(
        _ngram_kernel,
        out_shape=jax.ShapeDtypeStruct((B_pad, Vp), jnp.float32),
        grid_spec=pltpu.PrefetchScalarGridSpec(
            num_scalar_prefetch=0,
            grid=grid,
            in_specs=[
                pl.BlockSpec((Bt, C),    lambda b: (b, 0)),   # token ids (tiled)
                # Constant index_maps -> weights stay VMEM-resident across tiles.
                pl.BlockSpec((C * V, H), lambda b: (0, 0)),   # folded emb@w1^T
                pl.BlockSpec((1, H),     lambda b: (0, 0)),   # b1
                pl.BlockSpec((H, Vp),    lambda b: (0, 0)),   # w2^T (padded)
                pl.BlockSpec((1, Vp),    lambda b: (0, 0)),   # b2 (padded)
            ],
            out_specs=pl.BlockSpec((Bt, Vp), lambda b: (b, 0)),
        ),
        compiler_params=pltpu.CompilerParams(
            dimension_semantics=("parallel",)),
    )(ids, tab, b1r, w2t, b2r)

    return out[:B, :V]


def _reference(inputs, emb_w, w1, b1, w2, b2):
    inputs = jnp.asarray(inputs, jnp.int32)
    if inputs.ndim == 1:
        inputs = inputs[None, :]
    embeds = emb_w[inputs].reshape(inputs.shape[0], -1)
    h = jnp.maximum(embeds @ w1.T + b1, 0.0)
    logits = h @ w2.T + b2
    return jax.nn.log_softmax(logits, axis=1)


if __name__ == "__main__":
    VOCAB = 32
    EMB_DIM = 16
    CONTEXT = 2
    HIDDEN = 128   # fixed in the PyTorch module
    BATCH = 512    # 2 tiles of 256 -> fills MXU M and gives both v7x cores work

    key = jax.random.PRNGKey(0)
    k_emb, k_w1, k_b1, k_w2, k_b2, k_in = jax.random.split(key, 6)

    emb_w = jax.random.normal(k_emb, (VOCAB, EMB_DIM), jnp.float32)
    lim1 = 1.0 / jnp.sqrt(CONTEXT * EMB_DIM)
    w1 = jax.random.uniform(k_w1, (HIDDEN, CONTEXT * EMB_DIM), jnp.float32, -lim1, lim1)
    b1 = jax.random.uniform(k_b1, (HIDDEN,), jnp.float32, -lim1, lim1)
    lim2 = 1.0 / jnp.sqrt(HIDDEN)
    w2 = jax.random.uniform(k_w2, (VOCAB, HIDDEN), jnp.float32, -lim2, lim2)
    b2 = jax.random.uniform(k_b2, (VOCAB,), jnp.float32, -lim2, lim2)

    inputs = jax.random.randint(k_in, (BATCH, CONTEXT), 0, VOCAB, jnp.int32)

    # Batched forward.
    log_probs = ngram_forward(inputs, emb_w, w1, b1, w2, b2)
    jax.block_until_ready(log_probs)
    ref = _reference(inputs, emb_w, w1, b1, w2, b2)
    assert log_probs.shape == (BATCH, VOCAB)
    assert jnp.allclose(log_probs, ref, atol=1e-4, rtol=1e-4)

    # Original module semantics: one context -> (1, vocab) log-probs.
    single = ngram_forward(inputs[0], emb_w, w1, b1, w2, b2)
    jax.block_until_ready(single)
    assert single.shape == (1, VOCAB)
    assert jnp.allclose(single, ref[0:1], atol=1e-4, rtol=1e-4)

    print("KERNEL_OK")
</pallas_src>

<mosaic_0001>
module attributes {stable_mosaic.version = 11 : i64} {
  func.func @_ngram_kernel(%arg0: i32, %arg1: memref<256x2xi32, #tpu.memory_space<vmem>>, %arg2: memref<64x128xf32, #tpu.memory_space<vmem>>, %arg3: memref<1x128xf32, #tpu.memory_space<vmem>>, %arg4: memref<128x128xf32, #tpu.memory_space<vmem>>, %arg5: memref<1x128xf32, #tpu.memory_space<vmem>>, %arg6: memref<256x128xf32, #tpu.memory_space<vmem>>) attributes {dimension_semantics = [#tpu.dimension_semantics<parallel>], iteration_bounds = array<i64: 2>, scalar_prefetch = 0 : i64, scratch_operands = 0 : i64, tpu.core_type = #tpu.core_type<tc>, window_params = [{transform_indices = @transform_0, window_bounds = array<i64: 256, 2>}, {pipeline_mode = #tpu.pipeline_mode<synchronous>, transform_indices = @transform_1, window_bounds = array<i64: 64, 128>}, {pipeline_mode = #tpu.pipeline_mode<synchronous>, transform_indices = @transform_2, window_bounds = array<i64: 1, 128>}, {pipeline_mode = #tpu.pipeline_mode<synchronous>, transform_indices = @transform_3, window_bounds = array<i64: 128, 128>}, {pipeline_mode = #tpu.pipeline_mode<synchronous>, transform_indices = @transform_4, window_bounds = array<i64: 1, 128>}, {transform_indices = @transform_5, window_bounds = array<i64: 256, 128>}]} {
    %0 = tpu.iota {dimensions = array<i32: 1>} : vector<256x64xi32>
    %c0 = arith.constant 0 : index
    %c0_0 = arith.constant 0 : index
    %1 = vector.load %arg1[%c0, %c0_0] : memref<256x2xi32, #tpu.memory_space<vmem>>, vector<256x1xi32>
    %2 = vector.broadcast %1 : vector<256x1xi32> to vector<256x64xi32>
    %3 = arith.cmpi eq, %0, %2 : vector<256x64xi32>
    %4 = arith.extui %3 : vector<256x64xi1> to vector<256x64xi32>
    %5 = arith.sitofp %4 : vector<256x64xi32> to vector<256x64xf32>
    %c0_1 = arith.constant 0 : index
    %c1 = arith.constant 1 : index
    %6 = vector.load %arg1[%c0_1, %c1] : memref<256x2xi32, #tpu.memory_space<vmem>>, vector<256x1xi32>
    %c32_i32 = arith.constant 32 : i32
    %7 = vector.broadcast %c32_i32 : i32 to vector<256x1xi32>
    %8 = arith.addi %6, %7 : vector<256x1xi32>
    %9 = vector.broadcast %8 : vector<256x1xi32> to vector<256x64xi32>
    %10 = arith.cmpi eq, %0, %9 : vector<256x64xi32>
    %11 = arith.extui %10 : vector<256x64xi1> to vector<256x64xi32>
    %12 = arith.sitofp %11 : vector<256x64xi32> to vector<256x64xf32>
    %13 = arith.addf %5, %12 : vector<256x64xf32>
    %c0_2 = arith.constant 0 : index
    %c0_3 = arith.constant 0 : index
    %14 = vector.load %arg2[%c0_2, %c0_3] : memref<64x128xf32, #tpu.memory_space<vmem>>, vector<64x128xf32>
    %cst = arith.constant dense<0.000000e+00> : vector<256x128xf32>
    %15 = tpu.matmul %13, %14, %cst {dimension_numbers = #tpu.dot_dimension_numbers<[1], [0], [0], [1], [0, 0, 1, 1], [], []>} : vector<256x64xf32>, vector<64x128xf32>, vector<256x128xf32> -> vector<256x128xf32>
    %c0_4 = arith.constant 0 : index
    %c0_5 = arith.constant 0 : index
    %16 = vector.load %arg3[%c0_4, %c0_5] : memref<1x128xf32, #tpu.memory_space<vmem>>, vector<1x128xf32>
    %17 = vector.broadcast %16 : vector<1x128xf32> to vector<256x128xf32>
    %18 = arith.addf %15, %17 : vector<256x128xf32>
    %cst_6 = arith.constant 0.000000e+00 : f32
    %19 = vector.broadcast %cst_6 : f32 to vector<256x128xf32>
    %20 = arith.maximumf %18, %19 : vector<256x128xf32>
    %c0_7 = arith.constant 0 : index
    %c0_8 = arith.constant 0 : index
    %21 = vector.load %arg4[%c0_7, %c0_8] : memref<128x128xf32, #tpu.memory_space<vmem>>, vector<128x128xf32>
    %cst_9 = arith.constant dense<0.000000e+00> : vector<256x128xf32>
    %22 = tpu.matmul %20, %21, %cst_9 {dimension_numbers = #tpu.dot_dimension_numbers<[1], [0], [0], [1], [0, 0, 1, 1], [], []>} : vector<256x128xf32>, vector<128x128xf32>, vector<256x128xf32> -> vector<256x128xf32>
    %c0_10 = arith.constant 0 : index
    %c0_11 = arith.constant 0 : index
    %23 = vector.load %arg5[%c0_10, %c0_11] : memref<1x128xf32, #tpu.memory_space<vmem>>, vector<1x128xf32>
    %24 = vector.broadcast %23 : vector<1x128xf32> to vector<256x128xf32>
    %25 = arith.addf %22, %24 : vector<256x128xf32>
    %cst_12 = arith.constant dense<0xFF800000> : vector<256xf32>
    %26 = vector.multi_reduction <maximumf>, %25, %cst_12 [1] : vector<256x128xf32> to vector<256xf32>
    %27 = vector.shape_cast %26 : vector<256xf32> to vector<256x1xf32>
    %28 = vector.broadcast %27 : vector<256x1xf32> to vector<256x128xf32>
    %29 = arith.subf %25, %28 : vector<256x128xf32>
    %30 = math.exp %29 : vector<256x128xf32>
    %cst_13 = arith.constant dense<0.000000e+00> : vector<256xf32>
    %31 = vector.multi_reduction <add>, %30, %cst_13 [1] : vector<256x128xf32> to vector<256xf32>
    %32 = vector.shape_cast %31 : vector<256xf32> to vector<256x1xf32>
    %33 = math.log %32 : vector<256x1xf32>
    %34 = arith.addf %33, %27 : vector<256x1xf32>
    %35 = vector.broadcast %34 : vector<256x1xf32> to vector<256x128xf32>
    %36 = arith.subf %25, %35 : vector<256x128xf32>
    %c0_14 = arith.constant 0 : index
    %c0_15 = arith.constant 0 : index
    %37 = vector.load %arg6[%c0_14, %c0_15] : memref<256x128xf32, #tpu.memory_space<vmem>>, vector<256x128xf32>
    tpu.vector_store %arg6[%c0_14, %c0_15], %36 {strides = array<i32>} : memref<256x128xf32, #tpu.memory_space<vmem>>, vector<256x128xf32>,
    return
  }
  func.func @transform_0(%arg0: i32) -> (i32, i32) {
    %c0_i32 = arith.constant 0 : i32
    %c0_i32_0 = arith.constant 0 : i32
    return %arg0, %c0_i32 : i32, i32
  }
  func.func @transform_1(%arg0: i32) -> (i32, i32) {
    %c0_i32 = arith.constant 0 : i32
    %c0_i32_0 = arith.constant 0 : i32
    %c0_i32_1 = arith.constant 0 : i32
    return %c0_i32, %c0_i32_0 : i32, i32
  }
  func.func @transform_2(%arg0: i32) -> (i32, i32) {
    %c0_i32 = arith.constant 0 : i32
    %c0_i32_0 = arith.constant 0 : i32
    %c0_i32_1 = arith.constant 0 : i32
    return %c0_i32, %c0_i32_0 : i32, i32
  }
  func.func @transform_3(%arg0: i32) -> (i32, i32) {
    %c0_i32 = arith.constant 0 : i32
    %c0_i32_0 = arith.constant 0 : i32
    %c0_i32_1 = arith.constant 0 : i32
    return %c0_i32, %c0_i32_0 : i32, i32
  }
  func.func @transform_4(%arg0: i32) -> (i32, i32) {
    %c0_i32 = arith.constant 0 : i32
    %c0_i32_0 = arith.constant 0 : i32
    %c0_i32_1 = arith.constant 0 : i32
    return %c0_i32, %c0_i32_0 : i32, i32
  }
  func.func @transform_5(%arg0: i32) -> (i32, i32) {
    %c0_i32 = arith.constant 0 : i32
    %c0_i32_0 = arith.constant 0 : i32
    return %arg0, %c0_i32 : i32, i32
  }
}

</mosaic_0001>

<bundles_post_ra>
// kernel: tpu_custom_call.1
= control target key start
LH: loop header
LB: loop body
LE: loop exit
PB: predicated region body
PF: predicated region fallthrough
CT: control target
= control target key end

     0   :  { %10 = vsyncpa [#allocation3], 0  ;;  %s3240_s0 = inlined_call_operand.vmem [shape: s32[512,2], index: 0, kind: input, shape index: {}]   ;;  %s3241_s1 = inlined_call_operand.vmem [shape: f32[64,128], index: 1, kind: input, shape index: {}]   ;;  %s3242_s2 = inlined_call_operand.vmem [shape: f32[1,128], index: 2, kind: input, shape index: {}]   ;;  %s3243_s3 = inlined_call_operand.vmem [shape: f32[128,128], index: 3, kind: input, shape index: {}]   ;;  %s3244_s4 = inlined_call_operand.vmem [shape: f32[1,128], index: 4, kind: input, shape index: {}]   ;;  %s3245_s5 = inlined_call_operand.hbm [shape: f32[512,128], index: 5, kind: output, shape index: {}]  }
   0x1   :  { %12 = vsyncpa [#allocation3 + $0x1], 0  ;;  %s2469_s18 = smov 0   ;;  %s2471_s19 = smov 0  }
   0x2   :  { %s2473_s20 = smov 0   ;;  %s2475_s21 = smov 0  }
   0x3 LB: > { %s2490_s22 = sadd.s32 4294967295, %s2431_s21   ;;  %s1785_s23 = sadd.s32 4294967294, %s2431_s21   ;;  %s2431_s21 = sphi %s2475_s21, %s3290_s21   ;;  %s2427_s20 = sphi %s2473_s20, %s3289_s20   ;;  %s2423_s19 = sphi %s2471_s19, %s3288_s19   ;;  %s2419_s18 = sphi %s2469_s18, %s3287_s18  }
   0x4   : > { %s2494_s24 = sadd.s32 1, %s2431_s21   ;;  %s135_s25 = sadd.s32 1, %s2427_s20 }
   0x5   : > { %s132_s26 = ssub.s32 %s2431_s21, %s2494_s24  ;;  %p145_p0 = scmp.ne.s32.totalorder %s2427_s20, %s2423_s19 }
   0x6   : > { %p133_p1 = scmp.eq.s32.totalorder %s132_s26, 0  ;;  %p146_p2 = scmp.eq.s32.totalorder %s2490_s22, 1 }
   0x7   : > { %p151_p3 = scmp.ne.s32.totalorder %s2423_s19, %s2419_s18  ;;  %p152_p4 = scmp.eq.s32.totalorder %s1785_s23, 1 }
   0x8   : > { %s2505_s27 = scalar_select %p133_p1, %s2427_s20, %s135_s25  }
   0x9   : > { %p2507_p5 = por %p146_p2, %p145_p0  ;;  %p2511_p6 = por %p152_p4, %p151_p3 }
   0xa   : > { %p1788_p7 = scmp.ge.s32.totalorder %s2431_s21, 1  ;;  %p191_p8 = scmp.lt.s32.totalorder %s2431_s21, 3 }
   0xc   : > { %p192_p9 = pnand %p1788_p7, %p191_p8 }
   0xe   : > { %195 = sbr.rel (%p192_p9) target bundleno = 1050 (0x41a), region = 40 }
  0x15   : > { %s1790_s30 = sshll.u32 %s2490_s22, 5  ;;  %v2433_v0 = vmov 0   ;;  %v708_v1 = vld [vmem:[%s3241_s1] sm:$0xff]  ;;  %v709_v2 = vld [vmem:[%s3241_s1 + $0x8] sm:$0xff]  ;;  %v710_v4 = vld [vmem:[%s3241_s1 + $0x10] sm:$0xff]  ;;  %v2434_v11 = vmov 1  }
  0x16   : > { %2237 = vset.pattern.permute.xlu1 %v2433_v0  ;;  %2236 = vset.pattern.permute.xlu0 %v2433_v0  ;;  %p220_p10 = scmp.lt.s32.totalorder %s1790_s30, 63  ;;  %v2128_v3 = vpack.c.bf16 %v709_v2, %v708_v1  ;;  %v711_v5 = vld [vmem:[%s3241_s1 + $0x18] sm:$0xff]  ;;  %v712_v17 = vld [vmem:[%s3241_s1 + $0x20] sm:$0xff]  ;;  %v713_v18 = vld [vmem:[%s3241_s1 + $0x28] sm:$0xff]  ;;  %vm723_vm2 = vcmask 523264   ;;  %s216_s15 = sand.u32 1, %s2423_s19  }
  0x17   : > { %v2132_v8 = vpack.c.bf16 %v711_v5, %v710_v4  ;;  %v714_v19 = vld [vmem:[%s3241_s1 + $0x30] sm:$0xff]  ;;  %v715_v20 = vld [vmem:[%s3241_s1 + $0x38] sm:$0xff]  ;;  %v2136_v21 = vpack.c.bf16 %v713_v18, %v712_v17  ;;  %v1077_v18 = vld [vmem:[%s3243_s3] sm:$0xff]  ;;  %s1895_s17 = sshll.u32 %s2490_s22, 12  ;;  %s3199_s22 = scalar_lea.sflag [#allocation3], %s216_s15 }
  0x18   : > { %s3292_s30 = smov (!%p220_p10, %s1790_s30), 63  ;;  %2129 = vmatprep.subr.bf16.mxu0 %v2128_v3  ;;  %v2140_v22 = vpack.c.bf16 %v715_v20, %v714_v19  ;;  %v1078_v19 = vld [vmem:[%s3243_s3 + $0x8] sm:$0xff]  ;;  %v1079_v20 = vld [vmem:[%s3243_s3 + $0x10] sm:$0xff]  ;;  %s2436_s7 = smov [#allocation2]  }
  0x19   : > { %s1791_s10 = sshll.u32 %s3292_s30, 3  ;;  %2131 = vmatpush3.bf16.msra.mxu0 %v2128_v3  ;;  %s3190_s30 = scalar_lea.hbm %s3245_s5, %s1895_s17 }
  0x1a   : > { %s2527_s13 = scalar_lea.vmem %s3240_s0, %s1791_s10  ;;  %2133 = vmatprep.subr.bf16.mxu0 %v2132_v8  ;;  %s2373_s8 = sshll.u32 %s2436_s7, 4  ;;  %s2374_s8 = int_to_ptr.vmem [resolvable:$false] %s2373_s8 }
  0x1b   : > { %v229_v6 = vld [vmem:[%s2527_s13 + $0x8] sm:$0xff]  ;;  %v228_v7 = vld [vmem:[%s2527_s13] sm:$0xff]  ;;  %v230_v10 = vld [vmem:[%s2527_s13 + $0x10] sm:$0xff]  ;;  %s2375_s9 = scalar_lea.vmem %s2374_s8, 8192 }
  0x1c   : > { %264 = vperm.xlu1 %2237, %v229_v6   ;;  %261 = vperm.xlu0 %2236, %v228_v7   ;;  %v452_v9 = vadd.s32 32, %v228_v7  ;;  %v453_v12 = vadd.s32 32, %v229_v6  ;;  %v454_v13 = vadd.s32 32, %v230_v10  ;;  %v231_v14 = vld [vmem:[%s2527_s13 + $0x18] sm:$0xff]  ;;  %v232_v16 = vld [vmem:[%s2527_s13 + $0x20] sm:$0xff]  ;;  %v233_v24 = vld [vmem:[%s2527_s13 + $0x28] sm:$0xff] }
  0x1d   : > { %2135 = vmatpush3.bf16.msra.mxu0 %v2132_v8  ;;  %v455_v15 = vadd.s32 32, %v231_v14  ;;  %v456_v23 = vadd.s32 32, %v232_v16  ;;  %v457_v25 = vadd.s32 32, %v233_v24  ;;  %v234_v26 = vld [vmem:[%s2527_s13 + $0x30] sm:$0xff]  ;;  %v235_v28 = vld [vmem:[%s2527_s13 + $0x38] sm:$0xff]  ;;  %v236_v30 = vld [vmem:[%s2527_s13 + $0x40] sm:$0xff] }
  0x1e   : > { %2137 = vmatprep.subr.bf16.mxu0 %v2136_v21  ;;  %v458_v27 = vadd.s32 32, %v234_v26  ;;  %v459_v29 = vadd.s32 32, %v235_v28  ;;  %v460_v31 = vadd.s32 32, %v236_v30  ;;  %v237_v32 = vld [vmem:[%s2527_s13 + $0x48] sm:$0xff]  ;;  %v238_v34 = vld [vmem:[%s2527_s13 + $0x50] sm:$0xff]  ;;  %v239_v36 = vld [vmem:[%s2527_s13 + $0x58] sm:$0xff] }
  0x1f   : > { %v461_v33 = vadd.s32 32, %v237_v32  ;;  %v462_v35 = vadd.s32 32, %v238_v34  ;;  %v463_v37 = vadd.s32 32, %v239_v36  ;;  %v240_v38 = vld [vmem:[%s2527_s13 + $0x60] sm:$0xff]  ;;  %v241_v40 = vld [vmem:[%s2527_s13 + $0x68] sm:$0xff]  ;;  %v242_v42 = vld [vmem:[%s2527_s13 + $0x70] sm:$0xff] }
  0x20   : > { %267 = vperm.xlu1 %2237, %v230_v10   ;;  %2238 = vset.pattern.permute.xlu0 %v2434_v11  ;;  %v464_v39 = vadd.s32 32, %v240_v38  ;;  %v465_v41 = vadd.s32 32, %v241_v40  ;;  %v466_v43 = vadd.s32 32, %v242_v42  ;;  %v243_v44 = vld [vmem:[%s2527_s13 + $0x78] sm:$0xff]  ;;  %v244_v46 = vld [vmem:[%s2527_s13 + $0x80] sm:$0xff]  ;;  %v245_v48 = vld [vmem:[%s2527_s13 + $0x88] sm:$0xff] }
  0x21   : > { %485 = vperm.xlu0 %2238, %v452_v9   ;;  %2139 = vmatpush3.bf16.msra.mxu0 %v2136_v21  ;;  %v467_v45 = vadd.s32 32, %v243_v44  ;;  %v468_v47 = vadd.s32 32, %v244_v46  ;;  %v469_v49 = vadd.s32 32, %v245_v48  ;;  %v246_v50 = vld [vmem:[%s2527_s13 + $0x90] sm:$0xff]  ;;  %v247_v52 = vld [vmem:[%s2527_s13 + $0x98] sm:$0xff]  ;;  %v248_v54 = vld [vmem:[%s2527_s13 + $0xa0] sm:$0xff] }
  0x22   : > { %2141 = vmatprep.subr.bf16.mxu0 %v2140_v22  ;;  %v470_v51 = vadd.s32 32, %v246_v50  ;;  %v471_v53 = vadd.s32 32, %v247_v52  ;;  %v472_v55 = vadd.s32 32, %v248_v54  ;;  %v249_v56 = vld [vmem:[%s2527_s13 + $0xa8] sm:$0xff]  ;;  %v250_v58 = vld [vmem:[%s2527_s13 + $0xb0] sm:$0xff]  ;;  %v251_v60 = vld [vmem:[%s2527_s13 + $0xb8] sm:$0xff] }
  0x23   : > { %v473_v57 = vadd.s32 32, %v249_v56  ;;  %v474_v59 = vadd.s32 32, %v250_v58  ;;  %v475_v61 = vadd.s32 32, %v251_v60  ;;  %v252_v62 = vld [vmem:[%s2527_s13 + $0xc0] sm:$0xff]  ;;  %v254_v2 = vld [vmem:[%s2527_s13 + $0xd0] sm:$0xff]  ;;  %v255_v4 = vld [vmem:[%s2527_s13 + $0xd8] sm:$0xff] }
  0x24   : > { %2239 = vset.pattern.permute.xlu1 %v2434_v11  ;;  %v476_v63 = vadd.s32 32, %v252_v62  ;;  %v478_v3 = vadd.s32 32, %v254_v2  ;;  %v479_v5 = vadd.s32 32, %v255_v4  ;;  %v256_v6 = vld [vmem:[%s2527_s13 + $0xe0] sm:$0xff]  ;;  %v257_v8 = vld [vmem:[%s2527_s13 + $0xe8] sm:$0xff]  ;;  %v258_v10 = vld [vmem:[%s2527_s13 + $0xf0] sm:$0xff] }
  0x25   : > { %488 = vperm.xlu1 %2239, %v453_v12   ;;  %491 = vperm.xlu0 %2238, %v454_v13   ;;  %v480_v7 = vadd.s32 32, %v256_v6  ;;  %v481_v9 = vadd.s32 32, %v257_v8  ;;  %v482_v11 = vadd.s32 32, %v258_v10  ;;  %v259_v12 = vld [vmem:[%s2527_s13 + $0xf8] sm:$0xff] }
  0x26   : > { %2143 = vmatpush3.bf16.msra.mxu0 %v2140_v22  ;;  %v483_v13 = vadd.s32 32, %v259_v12  ;;  %v2144_v22 = vpack.c.bf16 %v1078_v19, %v1077_v18 }
  0x28   : > { %2145 = vmatprep.subr.bf16.mxu0 %v2144_v22  ;;  %2176 = vmatprep.subr.bf16.mxu1 %v2144_v22 }
  0x29   : > { %2240 = vset.pattern.permute.xlu1 %v2433_v0  ;;  %494 = vperm.xlu0 %2238, %v455_v15   ;;  %v253_v0 = vld [vmem:[%s2527_s13 + $0xc8] sm:$0xff]  ;;  %s1789_s13 = sshll.u32 %s216_s15, 8 }
  0x2a   : > { %270 = vperm.xlu1 %2240, %v231_v14   ;;  %v477_v1 = vadd.s32 32, %v253_v0  ;;  %v226_v14 = vlaneseq  ;;  %2184 = vmatpush3.bf16.msra.mxu1 %v2144_v22  ;;  %s3094_s16 = scalar_lea.vmem [#allocation2], %s1789_s13 }
  0x2b   : > { %s1723_s23 = sshll.u32 %s3094_s16, 4  ;;  %s3192_s23 = int_to_ptr.vmem [resolvable:$true] %s1723_s23 }
  0x2c   : > { %v2579_v15 = vand.u32 127, %v226_v14  ;;  %s2369_s6 = scalar_lea.vmem %s3192_s23, 4096  ;;  %p2376_p0 = scmp.lt.s32.totalorder %s3192_s23, %s2374_s8 }
  0x2d   : > { %497 = vperm.xlu0 %2238, %v456_v23   ;;  %v1080_v23 = vld [vmem:[%s3243_s3 + $0x18] sm:$0xff]  ;;  %p2370_p11 = scmp.ne.s32.totalorder %s3192_s23, %s2369_s6  ;;  %p2377_p1 = scmp.lt.s32.totalorder %s2375_s9, %s2369_s6 }
  0x2e   : > { %273 = vperm.xlu1 %2240, %v232_v16  }
  0x2f   : > { %p2371_p12 = pnand %p2370_p11, %p2507_p5  ;;  %p2378_p2 = por %p2377_p1, %p2376_p0 }
  0x31   : > { %500 = vperm.xlu0 %2238, %v457_v25   ;;  %v2148_v25 = vpack.c.bf16 %v1080_v23, %v1079_v20  ;;  %p2372_p13 = pneg %p2371_p12 }
  0x32   : > { %276 = vperm.xlu1 %2240, %v233_v24  }
  0x33   : > { %2177 = vmatprep.subr.bf16.mxu1 %v2148_v25  ;;  %p2379_p3 = pnand %p2378_p2, %p2372_p13 }
  0x34   : > { %2185 = vmatpush3.bf16.msra.mxu1 %v2148_v25 }
  0x35   : > { %503 = vperm.xlu0 %2238, %v458_v27  }
  0x36   : > { %279 = vperm.xlu1 %2240, %v234_v26   ;;  %v2435_v26 = vmov 0.0  }
  0x39   : > { %506 = vperm.xlu0 %2238, %v459_v29   ;;  %v1081_v29 = vld [vmem:[%s3243_s3 + $0x20] sm:$0xff] }
  0x3a   : > { %282 = vperm.xlu1 %2240, %v235_v28  }
  0x3d   : > { %509 = vperm.xlu0 %2238, %v460_v31  }
  0x3e   : > { %285 = vperm.xlu1 %2240, %v236_v30   ;;  %v1082_v30 = vld [vmem:[%s3243_s3 + $0x28] sm:$0xff] }
  0x41   : > { %512 = vperm.xlu0 %2238, %v461_v33  }
  0x42   : > { %288 = vperm.xlu1 %2240, %v237_v32  }
  0x45   : > { %515 = vperm.xlu0 %2238, %v462_v35  }
  0x46   : > { %291 = vperm.xlu1 %2240, %v238_v34   ;;  %v2152_v34 = vpack.c.bf16 %v1082_v30, %v1081_v29 }
  0x48   : > { %2178 = vmatprep.subr.bf16.mxu1 %v2152_v34 }
  0x49   : > { %518 = vperm.xlu0 %2238, %v463_v37   ;;  %2186 = vmatpush3.bf16.msra.mxu1 %v2152_v34 }
  0x4a   : > { %294 = vperm.xlu1 %2240, %v239_v36  }
  0x4d   : > { %521 = vperm.xlu0 %2238, %v464_v39  }
  0x4e   : > { %297 = vperm.xlu1 %2240, %v240_v38  }
  0x51   : > { %524 = vperm.xlu0 %2238, %v465_v41   ;;  %v1083_v41 = vld [vmem:[%s3243_s3 + $0x30] sm:$0xff] }
  0x52   : > { %300 = vperm.xlu1 %2240, %v241_v40  }
  0x55   : > { %527 = vperm.xlu0 %2238, %v466_v43  }
  0x56   : > { %303 = vperm.xlu1 %2240, %v242_v42   ;;  %v1084_v42 = vld [vmem:[%s3243_s3 + $0x38] sm:$0xff] }
  0x59   : > { %530 = vperm.xlu0 %2238, %v467_v45  }
  0x5a   : > { %306 = vperm.xlu1 %2240, %v243_v44  }
  0x5d   : > { %533 = vperm.xlu0 %2238, %v468_v47  }
  0x5e   : > { %309 = vperm.xlu1 %2240, %v244_v46   ;;  %v2156_v46 = vpack.c.bf16 %v1084_v42, %v1083_v41 }
  0x60   : > { %2179 = vmatprep.subr.bf16.mxu1 %v2156_v46 }
  0x61   : > { %536 = vperm.xlu0 %2238, %v469_v49   ;;  %v1086_v49 = vld [vmem:[%s3243_s3 + $0x48] sm:$0xff]  ;;  %2187 = vmatpush3.bf16.msra.mxu1 %v2156_v46 }
  0x62   : > { %312 = vperm.xlu1 %2240, %v245_v48   ;;  %v1085_v48 = vld [vmem:[%s3243_s3 + $0x40] sm:$0xff] }
  0x65   : > { %539 = vperm.xlu0 %2238, %v470_v51  }
  0x66   : > { %315 = vperm.xlu1 %2240, %v246_v50  }
  0x69   : > { %542 = vperm.xlu0 %2238, %v471_v53  }
  0x6a   : > { %318 = vperm.xlu1 %2240, %v247_v52  }
  0x6d   : > { %545 = vperm.xlu0 %2238, %v472_v55  }
  0x6e   : > { %321 = vperm.xlu1 %2240, %v248_v54   ;;  %v2160_v54 = vpack.c.bf16 %v1086_v49, %v1085_v48 }
  0x70   : > { %2180 = vmatprep.subr.bf16.mxu1 %v2160_v54 }
  0x71   : > { %548 = vperm.xlu0 %2238, %v473_v57   ;;  %v1088_v57 = vld [vmem:[%s3243_s3 + $0x58] sm:$0xff]  ;;  %2188 = vmatpush3.bf16.msra.mxu1 %v2160_v54 }
  0x72   : > { %324 = vperm.xlu1 %2240, %v249_v56   ;;  %v1087_v56 = vld [vmem:[%s3243_s3 + $0x50] sm:$0xff] }
  0x75   : > { %551 = vperm.xlu0 %2238, %v474_v59  }
  0x76   : > { %327 = vperm.xlu1 %2240, %v250_v58  }
  0x79   : > { %554 = vperm.xlu0 %2238, %v475_v61  }
  0x7a   : > { %330 = vperm.xlu1 %2240, %v251_v60  }
  0x7d   : > { %557 = vperm.xlu0 %2238, %v476_v63  }
  0x7e   : > { %333 = vperm.xlu1 %2240, %v252_v62   ;;  %v2164_v62 = vpack.c.bf16 %v1088_v57, %v1087_v56 }
  0x80   : > { %2181 = vmatprep.subr.bf16.mxu1 %v2164_v62 }
  0x81   : > { %560 = vperm.xlu0 %2238, %v477_v1   ;;  %v1090_v1 = vld [vmem:[%s3243_s3 + $0x68] sm:$0xff]  ;;  %2189 = vmatpush3.bf16.msra.mxu1 %v2164_v62 }
  0x82   : > { %336 = vperm.xlu1 %2240, %v253_v0   ;;  %v1089_v0 = vld [vmem:[%s3243_s3 + $0x60] sm:$0xff] }
  0x85   : > { %563 = vperm.xlu0 %2238, %v478_v3  }
  0x86   : > { %339 = vperm.xlu1 %2240, %v254_v2  }
  0x89   : > { %566 = vperm.xlu0 %2238, %v479_v5  }
  0x8a   : > { %342 = vperm.xlu1 %2240, %v255_v4  }
  0x8d   : > { %569 = vperm.xlu0 %2238, %v480_v7  }
  0x8e   : > { %345 = vperm.xlu1 %2240, %v256_v6   ;;  %v2168_v6 = vpack.c.bf16 %v1090_v1, %v1089_v0 }
  0x90   : > { %2182 = vmatprep.subr.bf16.mxu1 %v2168_v6 }
  0x91   : > { %572 = vperm.xlu0 %2238, %v481_v9   ;;  %2190 = vmatpush3.bf16.msra.mxu1 %v2168_v6 }
  0x92   : > { %348 = vperm.xlu1 %2240, %v257_v8  }
  0x95   : > { %575 = vperm.xlu0 %2238, %v482_v11  }
  0x96   : > { %351 = vperm.xlu1 %2240, %v258_v10  }
  0x99   : > { %578 = vperm.xlu0 %2238, %v483_v13  }
  0x9a   : > { %354 = vperm.xlu1 %2240, %v259_v12  }
  0x9b   : > { %v265_v16 = vpop.permute.xlu1 %264  ;;  %v262_v17 = vpop.permute.xlu0 %261 }
  0x9c   : > { %vm356_vm0 = vcmp.eq.s32.totalorder %v2579_v15, %v262_v17  ;;  %vm357_vm3 = vcmp.eq.s32.totalorder %v2579_v15, %v265_v16 }
  0x9d   : > { %v1792_v27 = vsel %vm356_vm0, 1.0, %v2435_v26  ;;  %v1793_v35 = vsel %vm357_vm3, 1.0, %v2435_v26 }
  0x9f   : > { %v268_v21 = vpop.permute.xlu1 %267 }
  0xa0   : > { %v486_v24 = vpop.permute.xlu0 %485  ;;  %vm358_vm4 = vcmp.eq.s32.totalorder %v2579_v15, %v268_v21 }
  0xa1   : > { %vm580_vm1 = vcmp.eq.s32.totalorder %v2579_v15, %v486_v24  ;;  %v1794_v36 = vsel %vm358_vm4, 1.0, %v2435_v26 }
  0xa2   : > { %v1824_v28 = vsel %vm580_vm1, 1.0, %v2435_v26 }
  0xa3   : > { %v676_v31 = vadd.f32 %v1824_v28, %v1792_v27 }
  0xa4   : > { %v489_v32 = vpop.permute.xlu1 %488  ;;  %v492_v33 = vpop.permute.xlu0 %491 }
  0xa5   : > { %vm581_vm5 = vcmp.eq.s32.totalorder %v2579_v15, %v489_v32  ;;  %vm582_vm6 = vcmp.eq.s32.totalorder %v2579_v15, %v492_v33  ;;  %2000 = vmatprep.mubr.msk.f32.mxu0 %vm723_vm2, %v676_v31 }
  0xa6   : > { %v1825_v37 = vsel %vm581_vm5, 1.0, %v2435_v26  ;;  %v1826_v38 = vsel %vm582_vm6, 1.0, %v2435_v26 }
  0xa7   : > { %v677_v39 = vadd.f32 %v1825_v37, %v1793_v35  ;;  %v678_v40 = vadd.f32 %v1826_v38, %v1794_v36 }
  0xa8   : > { %v495_v43 = vpop.permute.xlu0 %494 }
  0xa9   : > { %vm583_vm7 = vcmp.eq.s32.totalorder %v2579_v15, %v495_v43  ;;  %v271_v44 = vpop.permute.xlu1 %270  ;;  %2001 = vmatmul.mubr.msk.f32.vlgmr.msra.gmra.mrb[0].mxu0 %vm723_vm2, %v677_v39 }
  0xaa   : > { %v1827_v45 = vsel %vm583_vm7, 1.0, %v2435_v26  ;;  %vm359_vm8 = vcmp.eq.s32.totalorder %v2579_v15, %v271_v44  ;;  %2003 = vmatprep.mubr.msk.f32.mxu0 %vm723_vm2, %v678_v40  ;;  %2147 = vmatpush3.bf16.msra.mxu0 %v2144_v22 }
  0xab   : > { %v1795_v47 = vsel %vm359_vm8, 1.0, %v2435_v26  ;;  %2149 = vmatprep.subr.bf16.mxu0 %v2148_v25 }
  0xac   : > { %v679_v50 = vadd.f32 %v1827_v45, %v1795_v47  ;;  %v498_v51 = vpop.permute.xlu0 %497 }
  0xad   : > { %vm584_vm9 = vcmp.eq.s32.totalorder %v2579_v15, %v498_v51  ;;  %v274_v52 = vpop.permute.xlu1 %273 }
  0xae   : > { %v1828_v53 = vsel %vm584_vm9, 1.0, %v2435_v26  ;;  %vm360_vm10 = vcmp.eq.s32.totalorder %v2579_v15, %v274_v52  ;;  %2004 = vmatmul.mubr.msk.f32.gmra.mrb[2].mxu0 %vm723_vm2, %v679_v50 }
  0xaf   : > { %v1796_v55 = vsel %vm360_vm10, 1.0, %v2435_v26  ;;  %2151 = vmatpush3.bf16.msra.mxu0 %v2148_v25 }
  0xb0   : > { %v680_v58 = vadd.f32 %v1828_v53, %v1796_v55  ;;  %v501_v59 = vpop.permute.xlu0 %500  ;;  %2153 = vmatprep.subr.bf16.mxu0 %v2152_v34 }
  0xb1   : > { %vm585_vm11 = vcmp.eq.s32.totalorder %v2579_v15, %v501_v59  ;;  %v277_v60 = vpop.permute.xlu1 %276 }
  0xb2   : > { %v1829_v61 = vsel %vm585_vm11, 1.0, %v2435_v26  ;;  %vm361_vm12 = vcmp.eq.s32.totalorder %v2579_v15, %v277_v60  ;;  %2006 = vmatprep.mubr.msk.f32.mxu0 %vm723_vm2, %v680_v58 }
  0xb3   : > { %v1797_v63 = vsel %vm361_vm12, 1.0, %v2435_v26  ;;  %2155 = vmatpush3.bf16.msra.mxu0 %v2152_v34 }
  0xb4   : > { %v681_v2 = vadd.f32 %v1829_v61, %v1797_v63  ;;  %v504_v3 = vpop.permute.xlu0 %503  ;;  %2157 = vmatprep.subr.bf16.mxu0 %v2156_v46 }
  0xb5   : > { %vm586_vm13 = vcmp.eq.s32.totalorder %v2579_v15, %v504_v3  ;;  %v280_v4 = vpop.permute.xlu1 %279 }
  0xb6   : > { %v1830_v5 = vsel %vm586_vm13, 1.0, %v2435_v26  ;;  %vm362_vm14 = vcmp.eq.s32.totalorder %v2579_v15, %v280_v4  ;;  %2007 = vmatmul.mubr.msk.f32.gmra.mrb[4].mxu0 %vm723_vm2, %v681_v2 }
  0xb7   : > { %v1798_v7 = vsel %vm362_vm14, 1.0, %v2435_v26  ;;  %2159 = vmatpush3.bf16.msra.mxu0 %v2156_v46 }
  0xb8   : > { %v682_v8 = vadd.f32 %v1830_v5, %v1798_v7  ;;  %v507_v9 = vpop.permute.xlu0 %506  ;;  %2161 = vmatprep.subr.bf16.mxu0 %v2160_v54 }
  0xb9   : > { %vm587_vm15 = vcmp.eq.s32.totalorder %v2579_v15, %v507_v9  ;;  %v283_v10 = vpop.permute.xlu1 %282 }
  0xba   : > { %v1831_v11 = vsel %vm587_vm15, 1.0, %v2435_v26  ;;  %vm363_vm0 = vcmp.eq.s32.totalorder %v2579_v15, %v283_v10  ;;  %2009 = vmatprep.mubr.msk.f32.mxu0 %vm723_vm2, %v682_v8 }
  0xbb   : > { %v1799_v12 = vsel %vm363_vm0, 1.0, %v2435_v26  ;;  %2163 = vmatpush3.bf16.msra.mxu0 %v2160_v54 }
  0xbc   : > { %v683_v13 = vadd.f32 %v1831_v11, %v1799_v12  ;;  %v510_v14 = vpop.permute.xlu0 %509  ;;  %2165 = vmatprep.subr.bf16.mxu0 %v2164_v62 }
  0xbd   : > { %vm588_vm1 = vcmp.eq.s32.totalorder %v2579_v15, %v510_v14  ;;  %v286_v16 = vpop.permute.xlu1 %285 }
  0xbe   : > { %v1832_v17 = vsel %vm588_vm1, 1.0, %v2435_v26  ;;  %vm364_vm3 = vcmp.eq.s32.totalorder %v2579_v15, %v286_v16  ;;  %2010 = vmatmul.mubr.msk.f32.gmra.mrb[6].mxu0 %vm723_vm2, %v683_v13 }
  0xbf   : > { %v1800_v18 = vsel %vm364_vm3, 1.0, %v2435_v26  ;;  %2167 = vmatpush3.bf16.msra.mxu0 %v2164_v62 }
  0xc0   : > { %v684_v19 = vadd.f32 %v1832_v17, %v1800_v18  ;;  %v513_v20 = vpop.permute.xlu0 %512  ;;  %2169 = vmatprep.subr.bf16.mxu0 %v2168_v6 }
  0xc1   : > { %vm589_vm4 = vcmp.eq.s32.totalorder %v2579_v15, %v513_v20  ;;  %v289_v21 = vpop.permute.xlu1 %288 }
  0xc2   : > { %v1833_v22 = vsel %vm589_vm4, 1.0, %v2435_v26  ;;  %vm365_vm5 = vcmp.eq.s32.totalorder %v2579_v15, %v289_v21  ;;  %2012 = vmatprep.mubr.msk.f32.mxu0 %vm723_vm2, %v684_v19 }
  0xc3   : > { %v1801_v23 = vsel %vm365_vm5, 1.0, %v2435_v26  ;;  %2171 = vmatpush3.bf16.msra.mxu0 %v2168_v6 }
  0xc4   : > { %v685_v24 = vadd.f32 %v1833_v22, %v1801_v23  ;;  %v516_v25 = vpop.permute.xlu0 %515 }
  0xc5   : > { %vm590_vm6 = vcmp.eq.s32.totalorder %v2579_v15, %v516_v25  ;;  %v292_v27 = vpop.permute.xlu1 %291 }
  0xc6   : > { %v1834_v28 = vsel %vm590_vm6, 1.0, %v2435_v26  ;;  %vm366_vm7 = vcmp.eq.s32.totalorder %v2579_v15, %v292_v27  ;;  %2013 = vmatmul.mubr.msk.f32.gmra.mrb[8].mxu0 %vm723_vm2, %v685_v24 }
  0xc7   : > { %v1802_v29 = vsel %vm366_vm7, 1.0, %v2435_v26 }
  0xc8   : > { %v686_v30 = vadd.f32 %v1834_v28, %v1802_v29  ;;  %v519_v31 = vpop.permute.xlu0 %518 }
  0xc9   : > { %vm591_vm8 = vcmp.eq.s32.totalorder %v2579_v15, %v519_v31  ;;  %v295_v32 = vpop.permute.xlu1 %294 }
  0xca   : > { %v1835_v33 = vsel %vm591_vm8, 1.0, %v2435_v26  ;;  %vm367_vm9 = vcmp.eq.s32.totalorder %v2579_v15, %v295_v32  ;;  %2015 = vmatprep.mubr.msk.f32.mxu0 %vm723_vm2, %v686_v30 }
  0xcb   : > { %v1803_v34 = vsel %vm367_vm9, 1.0, %v2435_v26 }
  0xcc   : > { %v687_v35 = vadd.f32 %v1835_v33, %v1803_v34  ;;  %v522_v36 = vpop.permute.xlu0 %521 }
  0xcd   : > { %vm592_vm10 = vcmp.eq.s32.totalorder %v2579_v15, %v522_v36  ;;  %v298_v37 = vpop.permute.xlu1 %297  ;;  %v1092_v36 = vld [vmem:[%s3243_s3 + $0x78] sm:$0xff] }
  0xce   : > { %v1836_v38 = vsel %vm592_vm10, 1.0, %v2435_v26  ;;  %vm368_vm11 = vcmp.eq.s32.totalorder %v2579_v15, %v298_v37  ;;  %2016 = vmatmul.mubr.msk.f32.gmra.mrb[10].mxu0 %vm723_vm2, %v687_v35  ;;  %v1091_v35 = vld [vmem:[%s3243_s3 + $0x70] sm:$0xff] }
  0xcf   : > { %v1804_v39 = vsel %vm368_vm11, 1.0, %v2435_v26 }
  0xd0   : > { %v688_v40 = vadd.f32 %v1836_v38, %v1804_v39  ;;  %v525_v41 = vpop.permute.xlu0 %524  ;;  %v2172_v38 = vpack.c.bf16 %v1092_v36, %v1091_v35 }
  0xd1   : > { %vm593_vm12 = vcmp.eq.s32.totalorder %v2579_v15, %v525_v41  ;;  %v301_v42 = vpop.permute.xlu1 %300 }
  0xd2   : > { %v1837_v43 = vsel %vm593_vm12, 1.0, %v2435_v26  ;;  %vm369_vm13 = vcmp.eq.s32.totalorder %v2579_v15, %v301_v42  ;;  %2018 = vmatprep.mubr.msk.f32.mxu0 %vm723_vm2, %v688_v40  ;;  %2173 = vmatprep.subr.bf16.mxu0 %v2172_v38 }
  0xd3   : > { %v1805_v44 = vsel %vm369_vm13, 1.0, %v2435_v26  ;;  %2183 = vmatprep.subr.bf16.mxu1 %v2172_v38  ;;  %2175 = vmatpush3.bf16.msra.mxu0 %v2172_v38 }
  0xd4   : > { %v689_v45 = vadd.f32 %v1837_v43, %v1805_v44  ;;  %v528_v46 = vpop.permute.xlu0 %527  ;;  %2191 = vmatpush3.bf16.msra.mxu1 %v2172_v38 }
  0xd5   : > { %vm594_vm14 = vcmp.eq.s32.totalorder %v2579_v15, %v528_v46  ;;  %v304_v47 = vpop.permute.xlu1 %303 }
  0xd6   : > { %v1838_v48 = vsel %vm594_vm14, 1.0, %v2435_v26  ;;  %vm370_vm15 = vcmp.eq.s32.totalorder %v2579_v15, %v304_v47  ;;  %2019 = vmatmul.mubr.msk.f32.gmra.mrb[12].mxu0 %vm723_vm2, %v689_v45 }
  0xd7   : > { %v1806_v49 = vsel %vm370_vm15, 1.0, %v2435_v26 }
  0xd8   : > { %v690_v50 = vadd.f32 %v1838_v48, %v1806_v49  ;;  %v531_v51 = vpop.permute.xlu0 %530 }
  0xd9   : > { %vm595_vm0 = vcmp.eq.s32.totalorder %v2579_v15, %v531_v51  ;;  %v307_v52 = vpop.permute.xlu1 %306 }
  0xda   : > { %v1839_v53 = vsel %vm595_vm0, 1.0, %v2435_v26  ;;  %vm371_vm1 = vcmp.eq.s32.totalorder %v2579_v15, %v307_v52  ;;  %2021 = vmatprep.mubr.msk.f32.mxu0 %vm723_vm2, %v690_v50 }
  0xdb   : > { %v1807_v54 = vsel %vm371_vm1, 1.0, %v2435_v26 }
  0xdc   : > { %v691_v55 = vadd.f32 %v1839_v53, %v1807_v54  ;;  %v534_v56 = vpop.permute.xlu0 %533 }
  0xdd   : > { %vm596_vm3 = vcmp.eq.s32.totalorder %v2579_v15, %v534_v56  ;;  %v310_v57 = vpop.permute.xlu1 %309 }
  0xde   : > { %v1840_v58 = vsel %vm596_vm3, 1.0, %v2435_v26  ;;  %vm372_vm4 = vcmp.eq.s32.totalorder %v2579_v15, %v310_v57  ;;  %2022 = vmatmul.mubr.msk.f32.gmra.mrb[14].mxu0 %vm723_vm2, %v691_v55 }
  0xdf   : > { %v1808_v59 = vsel %vm372_vm4, 1.0, %v2435_v26 }
  0xe0   : > { %v692_v60 = vadd.f32 %v1840_v58, %v1808_v59  ;;  %v537_v61 = vpop.permute.xlu0 %536 }
  0xe1   : > { %vm597_vm5 = vcmp.eq.s32.totalorder %v2579_v15, %v537_v61  ;;  %v313_v62 = vpop.permute.xlu1 %312 }
  0xe2   : > { %v1841_v63 = vsel %vm597_vm5, 1.0, %v2435_v26  ;;  %vm373_vm6 = vcmp.eq.s32.totalorder %v2579_v15, %v313_v62  ;;  %2024 = vmatprep.mubr.msk.f32.mxu0 %vm723_vm2, %v692_v60 }
  0xe3   : > { %v1809_v0 = vsel %vm373_vm6, 1.0, %v2435_v26 }
  0xe4   : > { %v693_v1 = vadd.f32 %v1841_v63, %v1809_v0  ;;  %v540_v2 = vpop.permute.xlu0 %539 }
  0xe5   : > { %vm598_vm7 = vcmp.eq.s32.totalorder %v2579_v15, %v540_v2  ;;  %v316_v3 = vpop.permute.xlu1 %315 }
  0xe6   : > { %v1842_v4 = vsel %vm598_vm7, 1.0, %v2435_v26  ;;  %vm374_vm8 = vcmp.eq.s32.totalorder %v2579_v15, %v316_v3  ;;  %2025 = vmatmul.mubr.msk.f32.gmra.mrb[16].mxu0 %vm723_vm2, %v693_v1 }
  0xe7   : > { %v1810_v5 = vsel %vm374_vm8, 1.0, %v2435_v26 }
  0xe8   : > { %v694_v6 = vadd.f32 %v1842_v4, %v1810_v5  ;;  %v543_v7 = vpop.permute.xlu0 %542 }
  0xe9   : > { %vm599_vm9 = vcmp.eq.s32.totalorder %v2579_v15, %v543_v7  ;;  %v319_v8 = vpop.permute.xlu1 %318 }
  0xea   : > { %v1843_v9 = vsel %vm599_vm9, 1.0, %v2435_v26  ;;  %vm375_vm10 = vcmp.eq.s32.totalorder %v2579_v15, %v319_v8  ;;  %2027 = vmatprep.mubr.msk.f32.mxu0 %vm723_vm2, %v694_v6 }
  0xeb   : > { %v1811_v10 = vsel %vm375_vm10, 1.0, %v2435_v26 }
  0xec   : > { %v695_v11 = vadd.f32 %v1843_v9, %v1811_v10  ;;  %v546_v12 = vpop.permute.xlu0 %545 }
  0xed   : > { %vm600_vm11 = vcmp.eq.s32.totalorder %v2579_v15, %v546_v12  ;;  %v322_v13 = vpop.permute.xlu1 %321 }
  0xee   : > { %v1844_v14 = vsel %vm600_vm11, 1.0, %v2435_v26  ;;  %vm376_vm12 = vcmp.eq.s32.totalorder %v2579_v15, %v322_v13  ;;  %2028 = vmatmul.mubr.msk.f32.gmra.mrb[18].mxu0 %vm723_vm2, %v695_v11  ;;  %v2792_v13 = vld [vmem:[%s3242_s2] ss:$0 sm:$0xff] }
  0xef   : > { %v1812_v16 = vsel %vm376_vm12, 1.0, %v2435_v26 }
  0xf0   : > { %v696_v17 = vadd.f32 %v1844_v14, %v1812_v16  ;;  %v549_v18 = vpop.permute.xlu0 %548 }
  0xf1   : > { %vm601_vm13 = vcmp.eq.s32.totalorder %v2579_v15, %v549_v18  ;;  %v325_v19 = vpop.permute.xlu1 %324 }
  0xf2   : > { %v1845_v20 = vsel %vm601_vm13, 1.0, %v2435_v26  ;;  %vm377_vm14 = vcmp.eq.s32.totalorder %v2579_v15, %v325_v19  ;;  %2030 = vmatprep.mubr.msk.f32.mxu0 %vm723_vm2, %v696_v17 }
  0xf3   : > { %v1813_v21 = vsel %vm377_vm14, 1.0, %v2435_v26 }
  0xf4   : > { %v697_v22 = vadd.f32 %v1845_v20, %v1813_v21  ;;  %v552_v23 = vpop.permute.xlu0 %551 }
  0xf5   : > { %vm602_vm15 = vcmp.eq.s32.totalorder %v2579_v15, %v552_v23  ;;  %v328_v24 = vpop.permute.xlu1 %327 }
  0xf6   : > { %v1846_v25 = vsel %vm602_vm15, 1.0, %v2435_v26  ;;  %vm378_vm0 = vcmp.eq.s32.totalorder %v2579_v15, %v328_v24  ;;  %2031 = vmatmul.mubr.msk.f32.gmra.mrb[20].mxu0 %vm723_vm2, %v697_v22 }
  0xf7   : > { %v1814_v27 = vsel %vm378_vm0, 1.0, %v2435_v26 }
  0xf8   : > { %v698_v28 = vadd.f32 %v1846_v25, %v1814_v27  ;;  %v555_v29 = vpop.permute.xlu0 %554 }
  0xf9   : > { %vm603_vm1 = vcmp.eq.s32.totalorder %v2579_v15, %v555_v29  ;;  %v331_v30 = vpop.permute.xlu1 %330 }
  0xfa   : > { %v1847_v31 = vsel %vm603_vm1, 1.0, %v2435_v26  ;;  %vm379_vm3 = vcmp.eq.s32.totalorder %v2579_v15, %v331_v30  ;;  %2033 = vmatprep.mubr.msk.f32.mxu0 %vm723_vm2, %v698_v28 }
  0xfb   : > { %v1815_v32 = vsel %vm379_vm3, 1.0, %v2435_v26 }
  0xfc   : > { %v699_v33 = vadd.f32 %v1847_v31, %v1815_v32  ;;  %v558_v34 = vpop.permute.xlu0 %557 }
  0xfd   : > { %vm604_vm4 = vcmp.eq.s32.totalorder %v2579_v15, %v558_v34  ;;  %v334_v37 = vpop.permute.xlu1 %333 }
  0xfe   : > { %v1848_v39 = vsel %vm604_vm4, 1.0, %v2435_v26  ;;  %vm380_vm5 = vcmp.eq.s32.totalorder %v2579_v15, %v334_v37  ;;  %2034 = vmatmul.mubr.msk.f32.gmra.mrb[22].mxu0 %vm723_vm2, %v699_v33 }
  0xff   : > { %v1816_v40 = vsel %vm380_vm5, 1.0, %v2435_v26 }
 0x100   : > { %v700_v41 = vadd.f32 %v1848_v39, %v1816_v40  ;;  %v561_v42 = vpop.permute.xlu0 %560 }
 0x101   : > { %vm605_vm6 = vcmp.eq.s32.totalorder %v2579_v15, %v561_v42  ;;  %v337_v43 = vpop.permute.xlu1 %336 }
 0x102   : > { %v1849_v44 = vsel %vm605_vm6, 1.0, %v2435_v26  ;;  %vm381_vm7 = vcmp.eq.s32.totalorder %v2579_v15, %v337_v43  ;;  %2036 = vmatprep.mubr.msk.f32.mxu0 %vm723_vm2, %v700_v41 }
 0x103   : > { %v1817_v45 = vsel %vm381_vm7, 1.0, %v2435_v26 }
 0x104   : > { %v701_v46 = vadd.f32 %v1849_v44, %v1817_v45  ;;  %v564_v47 = vpop.permute.xlu0 %563 }
 0x105   : > { %vm606_vm8 = vcmp.eq.s32.totalorder %v2579_v15, %v564_v47  ;;  %v340_v48 = vpop.permute.xlu1 %339 }
 0x106   : > { %v1850_v49 = vsel %vm606_vm8, 1.0, %v2435_v26  ;;  %vm382_vm9 = vcmp.eq.s32.totalorder %v2579_v15, %v340_v48  ;;  %2037 = vmatmul.mubr.msk.f32.gmra.mrb[24].mxu0 %vm723_vm2, %v701_v46 }
 0x107   : > { %v1818_v50 = vsel %vm382_vm9, 1.0, %v2435_v26 }
 0x108   : > { %v702_v51 = vadd.f32 %v1850_v49, %v1818_v50  ;;  %v567_v52 = vpop.permute.xlu0 %566 }
 0x109   : > { %vm607_vm10 = vcmp.eq.s32.totalorder %v2579_v15, %v567_v52  ;;  %v343_v53 = vpop.permute.xlu1 %342 }
 0x10a   : > { %v1851_v54 = vsel %vm607_vm10, 1.0, %v2435_v26  ;;  %vm383_vm11 = vcmp.eq.s32.totalorder %v2579_v15, %v343_v53  ;;  %2039 = vmatprep.mubr.msk.f32.mxu0 %vm723_vm2, %v702_v51 }
 0x10b   : > { %v1819_v55 = vsel %vm383_vm11, 1.0, %v2435_v26 }
 0x10c   : > { %v703_v56 = vadd.f32 %v1851_v54, %v1819_v55  ;;  %v570_v57 = vpop.permute.xlu0 %569 }
 0x10d   : > { %vm608_vm12 = vcmp.eq.s32.totalorder %v2579_v15, %v570_v57  ;;  %v346_v58 = vpop.permute.xlu1 %345 }
 0x10e   : > { %v1852_v59 = vsel %vm608_vm12, 1.0, %v2435_v26  ;;  %vm384_vm13 = vcmp.eq.s32.totalorder %v2579_v15, %v346_v58  ;;  %2040 = vmatmul.mubr.msk.f32.gmra.mrb[26].mxu0 %vm723_vm2, %v703_v56 }
 0x10f   : > { %v1820_v60 = vsel %vm384_vm13, 1.0, %v2435_v26 }
 0x110   : > { %v704_v61 = vadd.f32 %v1852_v59, %v1820_v60  ;;  %v573_v62 = vpop.permute.xlu0 %572 }
 0x111   : > { %vm609_vm14 = vcmp.eq.s32.totalorder %v2579_v15, %v573_v62  ;;  %v349_v63 = vpop.permute.xlu1 %348 }
 0x112   : > { %v1853_v0 = vsel %vm609_vm14, 1.0, %v2435_v26  ;;  %vm385_vm15 = vcmp.eq.s32.totalorder %v2579_v15, %v349_v63  ;;  %2042 = vmatprep.mubr.msk.f32.mxu0 %vm723_vm2, %v704_v61 }
 0x113   : > { %v1821_v1 = vsel %vm385_vm15, 1.0, %v2435_v26 }
 0x114   : > { %v705_v2 = vadd.f32 %v1853_v0, %v1821_v1  ;;  %v576_v3 = vpop.permute.xlu0 %575 }
 0x115   : > { %vm610_vm0 = vcmp.eq.s32.totalorder %v2579_v15, %v576_v3  ;;  %v352_v4 = vpop.permute.xlu1 %351 }
 0x116   : > { %v1854_v5 = vsel %vm610_vm0, 1.0, %v2435_v26  ;;  %vm386_vm1 = vcmp.eq.s32.totalorder %v2579_v15, %v352_v4  ;;  %2043 = vmatmul.mubr.msk.f32.gmra.mrb[28].mxu0 %vm723_vm2, %v705_v2 }
 0x117   : > { %v1822_v6 = vsel %vm386_vm1, 1.0, %v2435_v26 }
 0x118   : > { %v706_v7 = vadd.f32 %v1854_v5, %v1822_v6  ;;  %v579_v8 = vpop.permute.xlu0 %578 }
 0x119   : > { %vm611_vm3 = vcmp.eq.s32.totalorder %v2579_v15, %v579_v8  ;;  %v355_v9 = vpop.permute.xlu1 %354 }
 0x11a   : > { %v1855_v10 = vsel %vm611_vm3, 1.0, %v2435_v26  ;;  %vm387_vm4 = vcmp.eq.s32.totalorder %v2579_v15, %v355_v9  ;;  %2045 = vmatprep.mubr.msk.f32.mxu0 %vm723_vm2, %v706_v7 }
 0x11b   : > { %v1823_v11 = vsel %vm387_vm4, 1.0, %v2435_v26 }
 0x11c   : > { %v707_v12 = vadd.f32 %v1855_v10, %v1823_v11 }
 0x11e   : > { %2046 = vmatmul.mubr.msk.f32.gmra.mrb[30].mxu0 %vm723_vm2, %v707_v12 }
 0x17c   : > { %v2002_v14 = vpop.f32.mrb[0].mxu0 }
 0x17d   : > { %v892_v16 = vadd.f32 %v2002_v14, %v2792_v13  ;;  %v886_v17 = vpop.f32.mrb[1].mxu0 }
 0x17e   : > { %v887_v18 = vadd.f32 %v2792_v13, %v886_v17 }
 0x17f   : > { %v1046_v15 = vmax.f32 %v892_v16, 0.0 }
 0x180   : > { %v1045_v19 = vmax.f32 %v887_v18, 0.0 }
 0x181   : > { %v2005_v20 = vpop.f32.mrb[2].mxu0 }
 0x182   : > { %v902_v21 = vadd.f32 %v2005_v20, %v2792_v13  ;;  %v896_v26 = vpop.f32.mrb[3].mxu0  ;;  %2080 = vmatprep.mubr.f32.mxu0 %v1045_v19 }
 0x183   : > { %v897_v22 = vadd.f32 %v2792_v13, %v896_v26  ;;  %2081 = vmatmul.mubr.f32.vlgmr.msra.gmra.mrb[32].mxu0 %v1046_v15 }
 0x184   : > { %v1048_v24 = vmax.f32 %v902_v21, 0.0 }
 0x185   : > { %v1047_v23 = vmax.f32 %v897_v22, 0.0 }
 0x187   : > { %2083 = vmatprep.mubr.f32.mxu0 %v1047_v23 }
 0x188   : > { %2084 = vmatmul.mubr.f32.gmra.mrb[34].mxu0 %v1048_v24 }
 0x189   : > { %v2008_v25 = vpop.f32.mrb[4].mxu0 }
 0x18a   : > { %v912_v27 = vadd.f32 %v2008_v25, %v2792_v13  ;;  %v906_v28 = vpop.f32.mrb[5].mxu0 }
 0x18b   : > { %v907_v29 = vadd.f32 %v2792_v13, %v906_v28 }
 0x18c   : > { %v1050_v31 = vmax.f32 %v912_v27, 0.0 }
 0x18d   : > { %v1049_v30 = vmax.f32 %v907_v29, 0.0 }
 0x18f   : > { %2086 = vmatprep.mubr.f32.mxu1 %v1049_v30 }
 0x190   : > { %2087 = vmatmul.mubr.f32.vlgmr.msra.gmra.mrb[0].mxu1 %v1050_v31 }
 0x191   : > { %v2011_v32 = vpop.f32.mrb[6].mxu0 }
 0x192   : > { %v922_v33 = vadd.f32 %v2011_v32, %v2792_v13  ;;  %v916_v34 = vpop.f32.mrb[7].mxu0 }
 0x193   : > { %v917_v35 = vadd.f32 %v2792_v13, %v916_v34 }
 0x194   : > { %v1052_v37 = vmax.f32 %v922_v33, 0.0 }
 0x195   : > { %v1051_v36 = vmax.f32 %v917_v35, 0.0 }
 0x197   : > { %2089 = vmatprep.mubr.f32.mxu1 %v1051_v36 }
 0x198   : > { %2090 = vmatmul.mubr.f32.gmra.mrb[2].mxu1 %v1052_v37 }
 0x199   : > { %v2014_v38 = vpop.f32.mrb[8].mxu0 }
 0x19a   : > { %v932_v39 = vadd.f32 %v2014_v38, %v2792_v13  ;;  %v926_v40 = vpop.f32.mrb[9].mxu0 }
 0x19b   : > { %v927_v41 = vadd.f32 %v2792_v13, %v926_v40 }
 0x19c   : > { %v1054_v43 = vmax.f32 %v932_v39, 0.0 }
 0x19d   : > { %v1053_v42 = vmax.f32 %v927_v41, 0.0 }
 0x19f   : > { %2092 = vmatprep.mubr.f32.mxu1 %v1053_v42 }
 0x1a0   : > { %2093 = vmatmul.mubr.f32.gmra.mrb[4].mxu1 %v1054_v43 }
 0x1a1   : > { %v2017_v44 = vpop.f32.mrb[10].mxu0 }
 0x1a2   : > { %v942_v45 = vadd.f32 %v2017_v44, %v2792_v13  ;;  %v936_v46 = vpop.f32.mrb[11].mxu0 }
 0x1a3   : > { %v937_v47 = vadd.f32 %v2792_v13, %v936_v46 }
 0x1a4   : > { %v1056_v49 = vmax.f32 %v942_v45, 0.0 }
 0x1a5   : > { %v1055_v48 = vmax.f32 %v937_v47, 0.0  ;;  %v2829_v47 = vld [vmem:[%s3244_s4] ss:$0 sm:$0xff] }
 0x1a7   : > { %2095 = vmatprep.mubr.f32.mxu1 %v1055_v48 }
 0x1a8   : > { %2096 = vmatmul.mubr.f32.gmra.mrb[6].mxu1 %v1056_v49 }
 0x1a9   : > { %v2020_v50 = vpop.f32.mrb[12].mxu0 }
 0x1aa   : > { %v952_v51 = vadd.f32 %v2020_v50, %v2792_v13  ;;  %v946_v52 = vpop.f32.mrb[13].mxu0 }
 0x1ab   : > { %v947_v53 = vadd.f32 %v2792_v13, %v946_v52 }
 0x1ac   : > { %v1058_v55 = vmax.f32 %v952_v51, 0.0 }
 0x1ad   : > { %v1057_v54 = vmax.f32 %v947_v53, 0.0 }
 0x1af   : > { %2098 = vmatprep.mubr.f32.mxu1 %v1057_v54 }
 0x1b0   : > { %2099 = vmatmul.mubr.f32.gmra.mrb[8].mxu1 %v1058_v55 }
 0x1b1   : > { %v2023_v56 = vpop.f32.mrb[14].mxu0 }
 0x1b2   : > { %v962_v57 = vadd.f32 %v2023_v56, %v2792_v13  ;;  %v956_v58 = vpop.f32.mrb[15].mxu0 }
 0x1b3   : > { %v957_v59 = vadd.f32 %v2792_v13, %v956_v58 }
 0x1b4   : > { %v1060_v61 = vmax.f32 %v962_v57, 0.0 }
 0x1b5   : > { %v1059_v60 = vmax.f32 %v957_v59, 0.0 }
 0x1b7   : > { %2101 = vmatprep.mubr.f32.mxu1 %v1059_v60 }
 0x1b8   : > { %2102 = vmatmul.mubr.f32.gmra.mrb[10].mxu1 %v1060_v61 }
 0x1b9   : > { %v2026_v62 = vpop.f32.mrb[16].mxu0 }
 0x1ba   : > { %v972_v63 = vadd.f32 %v2026_v62, %v2792_v13  ;;  %v966_v0 = vpop.f32.mrb[17].mxu0 }
 0x1bb   : > { %v967_v1 = vadd.f32 %v2792_v13, %v966_v0 }
 0x1bc   : > { %v1062_v3 = vmax.f32 %v972_v63, 0.0 }
 0x1bd   : > { %v1061_v2 = vmax.f32 %v967_v1, 0.0 }
 0x1bf   : > { %2104 = vmatprep.mubr.f32.mxu1 %v1061_v2 }
 0x1c0   : > { %2105 = vmatmul.mubr.f32.gmra.mrb[12].mxu1 %v1062_v3 }
 0x1c1   : > { %v2029_v4 = vpop.f32.mrb[18].mxu0 }
 0x1c2   : > { %v982_v5 = vadd.f32 %v2029_v4, %v2792_v13  ;;  %v976_v6 = vpop.f32.mrb[19].mxu0 }
 0x1c3   : > { %v977_v7 = vadd.f32 %v2792_v13, %v976_v6 }
 0x1c4   : > { %v1064_v9 = vmax.f32 %v982_v5, 0.0 }
 0x1c5   : > { %v1063_v8 = vmax.f32 %v977_v7, 0.0 }
 0x1c7   : > { %2107 = vmatprep.mubr.f32.mxu1 %v1063_v8 }
 0x1c8   : > { %2108 = vmatmul.mubr.f32.gmra.mrb[14].mxu1 %v1064_v9 }
 0x1c9   : > { %v2032_v10 = vpop.f32.mrb[20].mxu0 }
 0x1ca   : > { %v992_v11 = vadd.f32 %v2032_v10, %v2792_v13  ;;  %v986_v12 = vpop.f32.mrb[21].mxu0 }
 0x1cb   : > { %v987_v14 = vadd.f32 %v2792_v13, %v986_v12 }
 0x1cc   : > { %v1066_v17 = vmax.f32 %v992_v11, 0.0 }
 0x1cd   : > { %v1065_v16 = vmax.f32 %v987_v14, 0.0 }
 0x1cf   : > { %2110 = vmatprep.mubr.f32.mxu1 %v1065_v16 }
 0x1d0   : > { %2111 = vmatmul.mubr.f32.gmra.mrb[16].mxu1 %v1066_v17 }
 0x1d1   : > { %v2035_v18 = vpop.f32.mrb[22].mxu0 }
 0x1d2   : > { %v1002_v19 = vadd.f32 %v2035_v18, %v2792_v13  ;;  %v996_v15 = vpop.f32.mrb[23].mxu0 }
 0x1d3   : > { %v997_v20 = vadd.f32 %v2792_v13, %v996_v15 }
 0x1d4   : > { %v1068_v26 = vmax.f32 %v1002_v19, 0.0 }
 0x1d5   : > { %v1067_v21 = vmax.f32 %v997_v20, 0.0 }
 0x1d7   : > { %2113 = vmatprep.mubr.f32.mxu1 %v1067_v21 }
 0x1d8   : > { %2114 = vmatmul.mubr.f32.gmra.mrb[18].mxu1 %v1068_v26 }
 0x1d9   : > { %v2038_v22 = vpop.f32.mrb[24].mxu0 }
 0x1da   : > { %v1012_v23 = vadd.f32 %v2038_v22, %v2792_v13  ;;  %v1006_v24 = vpop.f32.mrb[25].mxu0 }
 0x1db   : > { %v1007_v25 = vadd.f32 %v2792_v13, %v1006_v24 }
 0x1dc   : > { %v1070_v28 = vmax.f32 %v1012_v23, 0.0 }
 0x1dd   : > { %v1069_v27 = vmax.f32 %v1007_v25, 0.0 }
 0x1df   : > { %2116 = vmatprep.mubr.f32.mxu1 %v1069_v27 }
 0x1e0   : > { %2117 = vmatmul.mubr.f32.gmra.mrb[20].mxu1 %v1070_v28 }
 0x1e1   : > { %v2041_v29 = vpop.f32.mrb[26].mxu0 }
 0x1e2   : > { %v1022_v30 = vadd.f32 %v2041_v29, %v2792_v13  ;;  %v1016_v31 = vpop.f32.mrb[27].mxu0 }
 0x1e3   : > { %v1017_v32 = vadd.f32 %v2792_v13, %v1016_v31 }
 0x1e4   : > { %v1072_v34 = vmax.f32 %v1022_v30, 0.0 }
 0x1e5   : > { %v1071_v33 = vmax.f32 %v1017_v32, 0.0 }
 0x1e7   : > { %2119 = vmatprep.mubr.f32.mxu1 %v1071_v33 }
 0x1e8   : > { %2120 = vmatmul.mubr.f32.gmra.mrb[22].mxu1 %v1072_v34 }
 0x1e9   : > { %v2044_v35 = vpop.f32.mrb[28].mxu0 }
 0x1ea   : > { %v1032_v36 = vadd.f32 %v2044_v35, %v2792_v13  ;;  %v1026_v37 = vpop.f32.mrb[29].mxu0 }
 0x1eb   : > { %v1027_v38 = vadd.f32 %v2792_v13, %v1026_v37 }
 0x1ec   : > { %v1074_v40 = vmax.f32 %v1032_v36, 0.0 }
 0x1ed   : > { %v1073_v39 = vmax.f32 %v1027_v38, 0.0 }
 0x1ef   : > { %2122 = vmatprep.mubr.f32.mxu1 %v1073_v39 }
 0x1f0   : > { %2123 = vmatmul.mubr.f32.gmra.mrb[24].mxu1 %v1074_v40 }
 0x1f1   : > { %v2047_v41 = vpop.f32.mrb[30].mxu0 }
 0x1f2   : > { %v1042_v42 = vadd.f32 %v2047_v41, %v2792_v13  ;;  %v1036_v43 = vpop.f32.mrb[31].mxu0 }
 0x1f3   : > { %v1037_v44 = vadd.f32 %v2792_v13, %v1036_v43 }
 0x1f4   : > { %v1076_v46 = vmax.f32 %v1042_v42, 0.0 }
 0x1f5   : > { %v1075_v45 = vmax.f32 %v1037_v44, 0.0 }
 0x1f7   : > { %2125 = vmatprep.mubr.f32.mxu1 %v1075_v45 }
 0x1f8   : > { %2126 = vmatmul.mubr.f32.gmra.mrb[26].mxu1 %v1076_v46 }
 0x256   : > { %v2082_v48 = vpop.f32.mrb[32].mxu0 }
 0x257   : > { %v2832_v49 = vadd.f32 %v2082_v48, %v2829_v47  ;;  %v1166_v50 = vpop.f32.mrb[33].mxu0 }
 0x258   : > { %v2835_v51 = vadd.f32 %v2829_v47, %v1166_v50 }
 0x259   : > { %1327 = vmax.xlane.f32.xlu0 %v2832_v49 }
 0x25a   : > { %1325 = vmax.xlane.f32.xlu1 %v2835_v51 }
 0x25b   : > { %v2085_v13 = vpop.f32.mrb[34].mxu0 }
 0x25c   : > { %v2840_v52 = vadd.f32 %v2085_v13, %v2829_v47  ;;  %v1176_v53 = vpop.f32.mrb[35].mxu0 }
 0x25d   : > { %v2843_v54 = vadd.f32 %v2829_v47, %v1176_v53 }
 0x25e   : > { %1331 = vmax.xlane.f32.xlu1 %v2840_v52 }
 0x25f   : > { %1329 = vmax.xlane.f32.xlu0 %v2843_v54 }
 0x263   : > { %v2088_v55 = vpop.f32.mrb[0].mxu1 }
 0x264   : > { %v2848_v56 = vadd.f32 %v2088_v55, %v2829_v47  ;;  %v1186_v57 = vpop.f32.mrb[1].mxu1 }
 0x265   : > { %v2851_v58 = vadd.f32 %v2829_v47, %v1186_v57 }
 0x266   : > { %1335 = vmax.xlane.f32.xlu1 %v2848_v56 }
 0x267   : > { %1333 = vmax.xlane.f32.xlu0 %v2851_v58 }
 0x26b   : > { %v2091_v59 = vpop.f32.mrb[2].mxu1 }
 0x26c   : > { %v2856_v60 = vadd.f32 %v2091_v59, %v2829_v47  ;;  %v1196_v61 = vpop.f32.mrb[3].mxu1 }
 0x26d   : > { %v2859_v62 = vadd.f32 %v2829_v47, %v1196_v61 }
 0x26e   : > { %1339 = vmax.xlane.f32.xlu1 %v2856_v60 }
 0x26f   : > { %1337 = vmax.xlane.f32.xlu0 %v2859_v62 }
 0x273   : > { %v2094_v63 = vpop.f32.mrb[4].mxu1 }
 0x274   : > { %v2864_v0 = vadd.f32 %v2094_v63, %v2829_v47  ;;  %v1206_v1 = vpop.f32.mrb[5].mxu1 }
 0x275   : > { %v2867_v2 = vadd.f32 %v2829_v47, %v1206_v1 }
 0x276   : > { %1343 = vmax.xlane.f32.xlu1 %v2864_v0 }
 0x277   : > { %1341 = vmax.xlane.f32.xlu0 %v2867_v2 }
 0x27b   : > { %v2097_v3 = vpop.f32.mrb[6].mxu1 }
 0x27c   : > { %v2872_v4 = vadd.f32 %v2097_v3, %v2829_v47  ;;  %v1216_v5 = vpop.f32.mrb[7].mxu1 }
 0x27d   : > { %v2875_v6 = vadd.f32 %v2829_v47, %v1216_v5 }
 0x27e   : > { %1347 = vmax.xlane.f32.xlu1 %v2872_v4 }
 0x27f   : > { %1345 = vmax.xlane.f32.xlu0 %v2875_v6 }
 0x283   : > { %v2100_v7 = vpop.f32.mrb[8].mxu1 }
 0x284   : > { %v2880_v8 = vadd.f32 %v2100_v7, %v2829_v47  ;;  %v1226_v9 = vpop.f32.mrb[9].mxu1 }
 0x285   : > { %v2883_v10 = vadd.f32 %v2829_v47, %v1226_v9 }
 0x286   : > { %1351 = vmax.xlane.f32.xlu1 %v2880_v8 }
 0x287   : > { %1349 = vmax.xlane.f32.xlu0 %v2883_v10 }
 0x28b   : > { %v2103_v11 = vpop.f32.mrb[10].mxu1 }
 0x28c   : > { %v2888_v12 = vadd.f32 %v2103_v11, %v2829_v47  ;;  %v1236_v14 = vpop.f32.mrb[11].mxu1 }
 0x28d   : > { %v2891_v16 = vadd.f32 %v2829_v47, %v1236_v14 }
 0x28e   : > { %1355 = vmax.xlane.f32.xlu1 %v2888_v12 }
 0x28f   : > { %1353 = vmax.xlane.f32.xlu0 %v2891_v16 }
 0x293   : > { %v2106_v17 = vpop.f32.mrb[12].mxu1 }
 0x294   : > { %v2896_v18 = vadd.f32 %v2106_v17, %v2829_v47  ;;  %v1246_v19 = vpop.f32.mrb[13].mxu1 }
 0x295   : > { %v2899_v15 = vadd.f32 %v2829_v47, %v1246_v19 }
 0x296   : > { %1359 = vmax.xlane.f32.xlu1 %v2896_v18 }
 0x297   : > { %1357 = vmax.xlane.f32.xlu0 %v2899_v15 }
 0x29b   : > { %v2109_v20 = vpop.f32.mrb[14].mxu1 }
 0x29c   : > { %v2904_v21 = vadd.f32 %v2109_v20, %v2829_v47  ;;  %v1256_v26 = vpop.f32.mrb[15].mxu1 }
 0x29d   : > { %v2907_v22 = vadd.f32 %v2829_v47, %v1256_v26 }
 0x29e   : > { %1363 = vmax.xlane.f32.xlu1 %v2904_v21 }
 0x29f   : > { %1361 = vmax.xlane.f32.xlu0 %v2907_v22 }
 0x2a3   : > { %v2112_v23 = vpop.f32.mrb[16].mxu1 }
 0x2a4   : > { %v2912_v24 = vadd.f32 %v2112_v23, %v2829_v47  ;;  %v1266_v25 = vpop.f32.mrb[17].mxu1 }
 0x2a5   : > { %v2915_v27 = vadd.f32 %v2829_v47, %v1266_v25 }
 0x2a6   : > { %3261 = vst [vmem:[#allocation5_spill] sm:$0xff] %v2912_v24  ;;  %1367 = vmax.xlane.f32.xlu1 %v2912_v24 }
 0x2a7   : > { %3262 = vst [vmem:[#allocation6_spill] sm:$0xff] %v2915_v27  ;;  %1365 = vmax.xlane.f32.xlu0 %v2915_v27 }
 0x2ab   : > { %v2115_v28 = vpop.f32.mrb[18].mxu1 }
 0x2ac   : > { %v2920_v29 = vadd.f32 %v2115_v28, %v2829_v47  ;;  %v1276_v30 = vpop.f32.mrb[19].mxu1 }
 0x2ad   : > { %v2923_v31 = vadd.f32 %v2829_v47, %v1276_v30 }
 0x2ae   : > { %3263 = vst [vmem:[#allocation7_spill] sm:$0xff] %v2920_v29  ;;  %1371 = vmax.xlane.f32.xlu1 %v2920_v29 }
 0x2af   : > { %3264 = vst [vmem:[#allocation8_spill] sm:$0xff] %v2923_v31  ;;  %1369 = vmax.xlane.f32.xlu0 %v2923_v31 }
 0x2b3   : > { %v2118_v32 = vpop.f32.mrb[20].mxu1 }
 0x2b4   : > { %v2928_v33 = vadd.f32 %v2118_v32, %v2829_v47  ;;  %v1286_v34 = vpop.f32.mrb[21].mxu1 }
 0x2b5   : > { %v2931_v35 = vadd.f32 %v2829_v47, %v1286_v34 }
 0x2b6   : > { %3265 = vst [vmem:[#allocation9_spill] sm:$0xff] %v2928_v33  ;;  %1375 = vmax.xlane.f32.xlu1 %v2928_v33 }
 0x2b7   : > { %3266 = vst [vmem:[#allocation10_spill] sm:$0xff] %v2931_v35  ;;  %1373 = vmax.xlane.f32.xlu0 %v2931_v35 }
 0x2bb   : > { %v2121_v36 = vpop.f32.mrb[22].mxu1 }
 0x2bc   : > { %v2936_v37 = vadd.f32 %v2121_v36, %v2829_v47  ;;  %v1296_v38 = vpop.f32.mrb[23].mxu1 }
 0x2bd   : > { %v2939_v39 = vadd.f32 %v2829_v47, %v1296_v38 }
 0x2be   : > { %3267 = vst [vmem:[#allocation11_spill] sm:$0xff] %v2936_v37  ;;  %1379 = vmax.xlane.f32.xlu1 %v2936_v37 }
 0x2bf   : > { %3268 = vst [vmem:[#allocation12_spill] sm:$0xff] %v2939_v39  ;;  %1377 = vmax.xlane.f32.xlu0 %v2939_v39 }
 0x2c3   : > { %v2124_v40 = vpop.f32.mrb[24].mxu1 }
 0x2c4   : > { %v2944_v41 = vadd.f32 %v2124_v40, %v2829_v47  ;;  %v1306_v42 = vpop.f32.mrb[25].mxu1 }
 0x2c5   : > { %v2947_v43 = vadd.f32 %v2829_v47, %v1306_v42 }
 0x2c6   : > { %3269 = vst [vmem:[#allocation13_spill] sm:$0xff] %v2944_v41  ;;  %1383 = vmax.xlane.f32.xlu1 %v2944_v41 }
 0x2c7   : > { %3270 = vst [vmem:[#allocation14_spill] sm:$0xff] %v2947_v43  ;;  %1381 = vmax.xlane.f32.xlu0 %v2947_v43 }
 0x2cb   : > { %v2127_v44 = vpop.f32.mrb[26].mxu1 }
 0x2cc   : > { %v2952_v45 = vadd.f32 %v2127_v44, %v2829_v47  ;;  %v1316_v46 = vpop.f32.mrb[27].mxu1 }
 0x2cd   : > { %v2955_v48 = vadd.f32 %v2829_v47, %v1316_v46 }
 0x2ce   : > { %3271 = vst [vmem:[#allocation15_spill] sm:$0xff] %v2952_v45  ;;  %1387 = vmax.xlane.f32.xlu1 %v2952_v45 }
 0x2cf   : > { %3272 = vst [vmem:[#allocation16_spill] sm:$0xff] %v2955_v48  ;;  %1385 = vmax.xlane.f32.xlu0 %v2955_v48 }
 0x2e6   : > { %v2959_v50 = vpop.xlane.xlu0 %1327 }
 0x2e7   : > { %v1390_v13 = vsub.f32 %v2832_v49, %v2959_v50  ;;  %v2963_v53 = vpop.xlane.xlu1 %1325 }
 0x2e8   : > { %v1389_v55 = vsub.f32 %v2835_v51, %v2963_v53 }
 0x2e9   : > { %v1423_v57 = vmul.f32 1.442695, %v1390_v13 }
 0x2ea   : > { %v1421_v59 = vmul.f32 1.442695, %v1389_v55 }
 0x2eb   : > { %2241 = vpow2.f32 %v1423_v57  ;;  %v2967_v61 = vpop.xlane.xlu1 %1331 }
 0x2ec   : > { %2243 = vpow2.f32 %v1421_v59  ;;  %v1392_v47 = vsub.f32 %v2840_v52, %v2967_v61  ;;  %v2971_v63 = vpop.xlane.xlu0 %1329 }
 0x2ed   : > { %v1391_v1 = vsub.f32 %v2843_v54, %v2971_v63 }
 0x2ee   : > { %v1427_v3 = vmul.f32 1.442695, %v1392_v47 }
 0x2ef   : > { %v1425_v5 = vmul.f32 1.442695, %v1391_v1 }
 0x2f0   : > { %2245 = vpow2.f32 %v1427_v3 }
 0x2f1   : > { %2247 = vpow2.f32 %v1425_v5 }
 0x2f3   : > { %v2975_v7 = vpop.xlane.xlu1 %1335 }
 0x2f4   : > { %v1394_v9 = vsub.f32 %v2848_v56, %v2975_v7  ;;  %v2979_v11 = vpop.xlane.xlu0 %1333 }
 0x2f5   : > { %v2242_v14 = vpop.eup %2241  ;;  %v1393_v17 = vsub.f32 %v2851_v58, %v2979_v11 }
 0x2f6   : > { %v2244_v19 = vpop.eup %2243  ;;  %v1431_v20 = vmul.f32 1.442695, %v1394_v9  ;;  %1487 = vadd.xlane.f32.xlu1 %v2242_v14 }
 0x2f7   : > { %v1429_v26 = vmul.f32 1.442695, %v1393_v17  ;;  %1485 = vadd.xlane.f32.xlu0 %v2244_v19 }
 0x2f8   : > { %2249 = vpow2.f32 %v1431_v20 }
 0x2f9   : > { %2251 = vpow2.f32 %v1429_v26 }
 0x2fa   : > { %v2246_v23 = vpop.eup %2245 }
 0x2fb   : > { %v2248_v25 = vpop.eup %2247  ;;  %v2983_v28 = vpop.xlane.xlu1 %1339  ;;  %1491 = vadd.xlane.f32.xlu1 %v2246_v23 }
 0x2fc   : > { %v1396_v30 = vsub.f32 %v2856_v60, %v2983_v28  ;;  %v2987_v32 = vpop.xlane.xlu0 %1337  ;;  %1489 = vadd.xlane.f32.xlu0 %v2248_v25 }
 0x2fd   : > { %v1395_v34 = vsub.f32 %v2859_v62, %v2987_v32 }
 0x2fe   : > { %v1435_v36 = vmul.f32 1.442695, %v1396_v30 }
 0x2ff   : > { %v1433_v38 = vmul.f32 1.442695, %v1395_v34 }
 0x300   : > { %2253 = vpow2.f32 %v1435_v36 }
 0x301   : > { %2255 = vpow2.f32 %v1433_v38 }
 0x302   : > { %v2250_v40 = vpop.eup %2249 }
 0x303   : > { %v2252_v42 = vpop.eup %2251  ;;  %v2991_v44 = vpop.xlane.xlu1 %1343  ;;  %1495 = vadd.xlane.f32.xlu1 %v2250_v40 }
 0x304   : > { %v1398_v46 = vsub.f32 %v2864_v0, %v2991_v44  ;;  %v2995_v13 = vpop.xlane.xlu0 %1341  ;;  %1493 = vadd.xlane.f32.xlu0 %v2252_v42 }
 0x305   : > { %v1397_v55 = vsub.f32 %v2867_v2, %v2995_v13 }
 0x306   : > { %v1439_v57 = vmul.f32 1.442695, %v1398_v46 }
 0x307   : > { %v1437_v59 = vmul.f32 1.442695, %v1397_v55 }
 0x308   : > { %2257 = vpow2.f32 %v1439_v57 }
 0x309   : > { %2259 = vpow2.f32 %v1437_v59 }
 0x30a   : > { %v2254_v47 = vpop.eup %2253 }
 0x30b   : > { %v2256_v1 = vpop.eup %2255  ;;  %v2999_v3 = vpop.xlane.xlu1 %1347  ;;  %1499 = vadd.xlane.f32.xlu1 %v2254_v47 }
 0x30c   : > { %v1400_v5 = vsub.f32 %v2872_v4, %v2999_v3  ;;  %v3003_v9 = vpop.xlane.xlu0 %1345  ;;  %1497 = vadd.xlane.f32.xlu0 %v2256_v1 }
 0x30d   : > { %v1399_v14 = vsub.f32 %v2875_v6, %v3003_v9 }
 0x30e   : > { %v1443_v17 = vmul.f32 1.442695, %v1400_v5 }
 0x30f   : > { %v1441_v19 = vmul.f32 1.442695, %v1399_v14 }
 0x310   : > { %2261 = vpow2.f32 %v1443_v17 }
 0x311   : > { %2263 = vpow2.f32 %v1441_v19 }
 0x312   : > { %v2258_v20 = vpop.eup %2257 }
 0x313   : > { %v2260_v26 = vpop.eup %2259  ;;  %v3007_v23 = vpop.xlane.xlu1 %1351  ;;  %1503 = vadd.xlane.f32.xlu1 %v2258_v20 }
 0x314   : > { %v1402_v25 = vsub.f32 %v2880_v8, %v3007_v23  ;;  %v3011_v30 = vpop.xlane.xlu0 %1349  ;;  %1501 = vadd.xlane.f32.xlu0 %v2260_v26 }
 0x315   : > { %v1401_v34 = vsub.f32 %v2883_v10, %v3011_v30 }
 0x316   : > { %v1447_v36 = vmul.f32 1.442695, %v1402_v25 }
 0x317   : > { %v1445_v38 = vmul.f32 1.442695, %v1401_v34 }
 0x318   : > { %2265 = vpow2.f32 %v1447_v36 }
 0x319   : > { %2267 = vpow2.f32 %v1445_v38 }
 0x31a   : > { %v2262_v40 = vpop.eup %2261 }
 0x31b   : > { %v2264_v42 = vpop.eup %2263  ;;  %v3015_v46 = vpop.xlane.xlu1 %1355  ;;  %1507 = vadd.xlane.f32.xlu1 %v2262_v40 }
 0x31c   : > { %v1404_v55 = vsub.f32 %v2888_v12, %v3015_v46  ;;  %v3019_v57 = vpop.xlane.xlu0 %1353  ;;  %1505 = vadd.xlane.f32.xlu0 %v2264_v42 }
 0x31d   : > { %v1403_v59 = vsub.f32 %v2891_v16, %v3019_v57 }
 0x31e   : > { %v1451_v47 = vmul.f32 1.442695, %v1404_v55 }
 0x31f   : > { %v1449_v1 = vmul.f32 1.442695, %v1403_v59 }
 0x320   : > { %2269 = vpow2.f32 %v1451_v47 }
 0x321   : > { %2271 = vpow2.f32 %v1449_v1 }
 0x322   : > { %v2266_v5 = vpop.eup %2265 }
 0x323   : > { %v2268_v14 = vpop.eup %2267  ;;  %v3023_v17 = vpop.xlane.xlu1 %1359  ;;  %1511 = vadd.xlane.f32.xlu1 %v2266_v5 }
 0x324   : > { %v1406_v19 = vsub.f32 %v2896_v18, %v3023_v17  ;;  %v3027_v20 = vpop.xlane.xlu0 %1357  ;;  %1509 = vadd.xlane.f32.xlu0 %v2268_v14 }
 0x325   : > { %v1405_v26 = vsub.f32 %v2899_v15, %v3027_v20 }
 0x326   : > { %v1455_v25 = vmul.f32 1.442695, %v1406_v19 }
 0x327   : > { %v1453_v34 = vmul.f32 1.442695, %v1405_v26 }
 0x328   : > { %2273 = vpow2.f32 %v1455_v25 }
 0x329   : > { %2275 = vpow2.f32 %v1453_v34 }
 0x32a   : > { %v2270_v36 = vpop.eup %2269 }
 0x32b   : > { %v2272_v38 = vpop.eup %2271  ;;  %v3031_v40 = vpop.xlane.xlu1 %1363  ;;  %1515 = vadd.xlane.f32.xlu1 %v2270_v36 }
 0x32c   : > { %v1408_v42 = vsub.f32 %v2904_v21, %v3031_v40  ;;  %v3035_v55 = vpop.xlane.xlu0 %1361  ;;  %1513 = vadd.xlane.f32.xlu0 %v2272_v38 }
 0x32d   : > { %v1407_v59 = vsub.f32 %v2907_v22, %v3035_v55 }
 0x32e   : > { %v1459_v47 = vmul.f32 1.442695, %v1408_v42 }
 0x32f   : > { %v1457_v1 = vmul.f32 1.442695, %v1407_v59 }
 0x330   : > { %2277 = vpow2.f32 %v1459_v47 }
 0x331   : > { %2279 = vpow2.f32 %v1457_v1 }
 0x332   : > { %v2274_v5 = vpop.eup %2273 }
 0x333   : > { %v2276_v14 = vpop.eup %2275  ;;  %v3039_v19 = vpop.xlane.xlu1 %1367  ;;  %1519 = vadd.xlane.f32.xlu1 %v2274_v5 }
 0x334   : > { %v1410_v26 = vsub.f32 %v2912_v24, %v3039_v19  ;;  %v3043_v25 = vpop.xlane.xlu0 %1365  ;;  %1517 = vadd.xlane.f32.xlu0 %v2276_v14 }
 0x335   : > { %v1409_v34 = vsub.f32 %v2915_v27, %v3043_v25 }
 0x336   : > { %v1463_v36 = vmul.f32 1.442695, %v1410_v26 }
 0x337   : > { %v1461_v38 = vmul.f32 1.442695, %v1409_v34 }
 0x338   : > { %2281 = vpow2.f32 %v1463_v36 }
 0x339   : > { %2283 = vpow2.f32 %v1461_v38 }
 0x33a   : > { %v2278_v42 = vpop.eup %2277 }
 0x33b   : > { %v2280_v59 = vpop.eup %2279  ;;  %v3047_v47 = vpop.xlane.xlu1 %1371  ;;  %1523 = vadd.xlane.f32.xlu1 %v2278_v42 }
 0x33c   : > { %v1412_v1 = vsub.f32 %v2920_v29, %v3047_v47  ;;  %v3051_v5 = vpop.xlane.xlu0 %1369  ;;  %1521 = vadd.xlane.f32.xlu0 %v2280_v59 }
 0x33d   : > { %v1411_v14 = vsub.f32 %v2923_v31, %v3051_v5 }
 0x33e   : > { %v1467_v24 = vmul.f32 1.442695, %v1412_v1 }
 0x33f   : > { %v1465_v27 = vmul.f32 1.442695, %v1411_v14 }
 0x340   : > { %2285 = vpow2.f32 %v1467_v24 }
 0x341   : > { %2287 = vpow2.f32 %v1465_v27 }
 0x342   : > { %v2282_v26 = vpop.eup %2281 }
 0x343   : > { %v2284_v34 = vpop.eup %2283  ;;  %v3055_v36 = vpop.xlane.xlu1 %1375  ;;  %1527 = vadd.xlane.f32.xlu1 %v2282_v26 }
 0x344   : > { %v1414_v38 = vsub.f32 %v2928_v33, %v3055_v36  ;;  %v3059_v42 = vpop.xlane.xlu0 %1373  ;;  %1525 = vadd.xlane.f32.xlu0 %v2284_v34 }
 0x345   : > { %v1413_v59 = vsub.f32 %v2931_v35, %v3059_v42 }
 0x346   : > { %v1471_v29 = vmul.f32 1.442695, %v1414_v38 }
 0x347   : > { %v1469_v31 = vmul.f32 1.442695, %v1413_v59 }
 0x348   : > { %2289 = vpow2.f32 %v1471_v29 }
 0x349   : > { %2291 = vpow2.f32 %v1469_v31 }
 0x34a   : > { %v2286_v24 = vpop.eup %2285 }
 0x34b   : > { %v2288_v27 = vpop.eup %2287  ;;  %v3063_v1 = vpop.xlane.xlu1 %1379  ;;  %1531 = vadd.xlane.f32.xlu1 %v2286_v24 }
 0x34c   : > { %v1416_v14 = vsub.f32 %v2936_v37, %v3063_v1  ;;  %v3067_v26 = vpop.xlane.xlu0 %1377  ;;  %1529 = vadd.xlane.f32.xlu0 %v2288_v27 }
 0x34d   : > { %v1415_v34 = vsub.f32 %v2939_v39, %v3067_v26 }
 0x34e   : > { %v1475_v33 = vmul.f32 1.442695, %v1416_v14 }
 0x34f   : > { %v1473_v35 = vmul.f32 1.442695, %v1415_v34 }
 0x350   : > { %2293 = vpow2.f32 %v1475_v33 }
 0x351   : > { %2295 = vpow2.f32 %v1473_v35 }
 0x352   : > { %v2290_v29 = vpop.eup %2289 }
 0x353   : > { %v2292_v31 = vpop.eup %2291  ;;  %v3071_v38 = vpop.xlane.xlu1 %1383  ;;  %1535 = vadd.xlane.f32.xlu1 %v2290_v29 }
 0x354   : > { %v1418_v59 = vsub.f32 %v2944_v41, %v3071_v38  ;;  %v3075_v24 = vpop.xlane.xlu0 %1381  ;;  %1533 = vadd.xlane.f32.xlu0 %v2292_v31 }
 0x355   : > { %v1417_v27 = vsub.f32 %v2947_v43, %v3075_v24 }
 0x356   : > { %v1479_v37 = vmul.f32 1.442695, %v1418_v59 }
 0x357   : > { %v1477_v39 = vmul.f32 1.442695, %v1417_v27 }
 0x358   : > { %2297 = vpow2.f32 %v1479_v37 }
 0x359   : > { %2299 = vpow2.f32 %v1477_v39 }
 0x35a   : > { %v2294_v33 = vpop.eup %2293 }
 0x35b   : > { %v2296_v35 = vpop.eup %2295  ;;  %1539 = vadd.xlane.f32.xlu1 %v2294_v33  ;;  %v3079_v14 = vpop.xlane.xlu1 %1387 }
 0x35c   : > { %v1420_v34 = vsub.f32 %v2952_v45, %v3079_v14  ;;  %1537 = vadd.xlane.f32.xlu0 %v2296_v35  ;;  %v3083_v29 = vpop.xlane.xlu0 %1385 }
 0x35d   : > { %3273 = vst [vmem:[#allocation17_spill] sm:$0xff] %v3083_v29  ;;  %v1419_v31 = vsub.f32 %v2955_v48, %v3083_v29 }
 0x35e   : > { %v1483_v41 = vmul.f32 1.442695, %v1420_v34 }
 0x35f   : > { %v1481_v43 = vmul.f32 1.442695, %v1419_v31 }
 0x360   : > { %2301 = vpow2.f32 %v1483_v41 }
 0x361   : > { %2303 = vpow2.f32 %v1481_v43 }
 0x362   : > { %v2298_v37 = vpop.eup %2297 }
 0x363   : > { %v2300_v39 = vpop.eup %2299  ;;  %1543 = vadd.xlane.f32.xlu1 %v2298_v37 }
 0x364   : > { %1541 = vadd.xlane.f32.xlu0 %v2300_v39 }
 0x36a   : > { %v2302_v59 = vpop.eup %2301 }
 0x36b   : > { %v2304_v27 = vpop.eup %2303  ;;  %1547 = vadd.xlane.f32.xlu1 %v2302_v59 }
 0x36c   : > { %1545 = vadd.xlane.f32.xlu0 %v2304_v27 }
 0x383   : > { %v1488_v33 = vpop.xlane.xlu1 %1487 }
 0x384   : > { %2305 = vlog2.f32 %v1488_v33  ;;  %v1486_v35 = vpop.xlane.xlu0 %1485 }
 0x385   : > { %2307 = vlog2.f32 %v1486_v35 }
 0x388   : > { %v1492_v45 = vpop.xlane.xlu1 %1491 }
 0x389   : > { %2309 = vlog2.f32 %v1492_v45  ;;  %v1490_v34 = vpop.xlane.xlu0 %1489 }
 0x38a   : > { %2311 = vlog2.f32 %v1490_v34 }
 0x38e   : > { %v2306_v41 = vpop.eup %2305 }
 0x38f   : > { %v2308_v43 = vpop.eup %2307  ;;  %v1552_v31 = vmul.f32 0.6931472, %v2306_v41 }
 0x390   : > { %v1550_v37 = vmul.f32 0.6931472, %v2308_v43  ;;  %v1496_v39 = vpop.xlane.xlu1 %1495 }
 0x391   : > { %v1614_v48 = vadd.f32 %v1552_v31, %v2959_v50  ;;  %2313 = vlog2.f32 %v1496_v39  ;;  %v1494_v59 = vpop.xlane.xlu0 %1493 }
 0x392   : > { %v1613_v27 = vadd.f32 %v1550_v37, %v2963_v53  ;;  %2315 = vlog2.f32 %v1494_v59 }
 0x393   : > { %v2310_v33 = vpop.eup %2309  ;;  %v1646_v45 = vsub.f32 %v2832_v49, %v1614_v48 }
 0x394   : > { %v2312_v35 = vpop.eup %2311  ;;  %v1645_v34 = vsub.f32 %v2835_v51, %v1613_v27  ;;  %v1556_v29 = vmul.f32 0.6931472, %v2310_v33 }
 0x395   : > { %1678 = vst [vmem:[%s3094_s16 + $0x8] sm:$0xff] %v1646_v45  ;;  %v1554_v50 = vmul.f32 0.6931472, %v2312_v35 }
 0x396   : > { %1677 = vst [vmem:[%s3094_s16] sm:$0xff] %v1645_v34  ;;  %v1616_v41 = vadd.f32 %v1556_v29, %v2967_v61 }
 0x397   : > { %v1615_v53 = vadd.f32 %v1554_v50, %v2971_v63 }
 0x398   : > { %v1648_v43 = vsub.f32 %v2840_v52, %v1616_v41  ;;  %v1500_v49 = vpop.xlane.xlu1 %1499 }
 0x399   : > { %v1647_v48 = vsub.f32 %v2843_v54, %v1615_v53  ;;  %2317 = vlog2.f32 %v1500_v49  ;;  %v1498_v51 = vpop.xlane.xlu0 %1497 }
 0x39a   : > { %1680 = vst [vmem:[%s3094_s16 + $0x18] sm:$0xff] %v1648_v43  ;;  %2319 = vlog2.f32 %v1498_v51 }
 0x39b   : > { %v2314_v31 = vpop.eup %2313  ;;  %1679 = vst [vmem:[%s3094_s16 + $0x10] sm:$0xff] %v1647_v48 }
 0x39c   : > { %v2316_v37 = vpop.eup %2315  ;;  %v1560_v39 = vmul.f32 0.6931472, %v2314_v31 }
 0x39d   : > { %v1558_v59 = vmul.f32 0.6931472, %v2316_v37 }
 0x39e   : > { %v1618_v61 = vadd.f32 %v1560_v39, %v2975_v7 }
 0x39f   : > { %v1617_v63 = vadd.f32 %v1558_v59, %v2979_v11 }
 0x3a0   : > { %v1650_v52 = vsub.f32 %v2848_v56, %v1618_v61  ;;  %v1504_v29 = vpop.xlane.xlu1 %1503 }
 0x3a1   : > { %v1649_v54 = vsub.f32 %v2851_v58, %v1617_v63  ;;  %2321 = vlog2.f32 %v1504_v29  ;;  %v1502_v27 = vpop.xlane.xlu0 %1501 }
 0x3a2   : > { %1682 = vst [vmem:[%s3094_s16 + $0x28] sm:$0xff] %v1650_v52  ;;  %2323 = vlog2.f32 %v1502_v27 }
 0x3a3   : > { %v2318_v33 = vpop.eup %2317  ;;  %1681 = vst [vmem:[%s3094_s16 + $0x20] sm:$0xff] %v1649_v54 }
 0x3a4   : > { %v2320_v45 = vpop.eup %2319  ;;  %v1564_v35 = vmul.f32 0.6931472, %v2318_v33 }
 0x3a5   : > { %v1562_v34 = vmul.f32 0.6931472, %v2320_v45 }
 0x3a6   : > { %v1620_v7 = vadd.f32 %v1564_v35, %v2983_v28 }
 0x3a7   : > { %v1619_v11 = vadd.f32 %v1562_v34, %v2987_v32 }
 0x3a8   : > { %v1652_v56 = vsub.f32 %v2856_v60, %v1620_v7  ;;  %v1508_v50 = vpop.xlane.xlu1 %1507 }
 0x3a9   : > { %v1651_v58 = vsub.f32 %v2859_v62, %v1619_v11  ;;  %2325 = vlog2.f32 %v1508_v50  ;;  %v1506_v41 = vpop.xlane.xlu0 %1505 }
 0x3aa   : > { %1684 = vst [vmem:[%s3094_s16 + $0x38] sm:$0xff] %v1652_v56  ;;  %2327 = vlog2.f32 %v1506_v41 }
 0x3ab   : > { %v2322_v53 = vpop.eup %2321  ;;  %1683 = vst [vmem:[%s3094_s16 + $0x30] sm:$0xff] %v1651_v58 }
 0x3ac   : > { %v2324_v43 = vpop.eup %2323  ;;  %v1568_v49 = vmul.f32 0.6931472, %v2322_v53 }
 0x3ad   : > { %v1566_v48 = vmul.f32 0.6931472, %v2324_v43 }
 0x3ae   : > { %v1622_v28 = vadd.f32 %v1568_v49, %v2991_v44 }
 0x3af   : > { %v1621_v32 = vadd.f32 %v1566_v48, %v2995_v13 }
 0x3b0   : > { %v1654_v60 = vsub.f32 %v2864_v0, %v1622_v28  ;;  %v1512_v51 = vpop.xlane.xlu1 %1511 }
 0x3b1   : > { %v1653_v62 = vsub.f32 %v2867_v2, %v1621_v32  ;;  %2329 = vlog2.f32 %v1512_v51  ;;  %v1510_v31 = vpop.xlane.xlu0 %1509 }
 0x3b2   : > { %1686 = vst [vmem:[%s3094_s16 + $0x48] sm:$0xff] %v1654_v60  ;;  %2331 = vlog2.f32 %v1510_v31 }
 0x3b3   : > { %v2326_v37 = vpop.eup %2325  ;;  %1685 = vst [vmem:[%s3094_s16 + $0x40] sm:$0xff] %v1653_v62 }
 0x3b4   : > { %v2328_v39 = vpop.eup %2327  ;;  %v1572_v59 = vmul.f32 0.6931472, %v2326_v37 }
 0x3b5   : > { %v1570_v61 = vmul.f32 0.6931472, %v2328_v39 }
 0x3b6   : > { %v1624_v44 = vadd.f32 %v1572_v59, %v2999_v3 }
 0x3b7   : > { %v1623_v13 = vadd.f32 %v1570_v61, %v3003_v9 }
 0x3b8   : > { %v1656_v0 = vsub.f32 %v2872_v4, %v1624_v44  ;;  %v1516_v63 = vpop.xlane.xlu1 %1515 }
 0x3b9   : > { %v1655_v2 = vsub.f32 %v2875_v6, %v1623_v13  ;;  %2333 = vlog2.f32 %v1516_v63  ;;  %v1514_v52 = vpop.xlane.xlu0 %1513  ;;  %v3274_v13 = vld [vmem:[#allocation5_spill] sm:$0xff]  ;;  %v3275_v63 = vld [vmem:[#allocation6_spill] sm:$0xff] }
 0x3ba   : > { %1688 = vst [vmem:[%s3094_s16 + $0x58] sm:$0xff] %v1656_v0  ;;  %2335 = vlog2.f32 %v1514_v52 }
 0x3bb   : > { %v2330_v29 = vpop.eup %2329  ;;  %1687 = vst [vmem:[%s3094_s16 + $0x50] sm:$0xff] %v1655_v2 }
 0x3bc   : > { %v2332_v54 = vpop.eup %2331  ;;  %v1576_v27 = vmul.f32 0.6931472, %v2330_v29 }
 0x3bd   : > { %v1574_v33 = vmul.f32 0.6931472, %v2332_v54 }
 0x3be   : > { %v1626_v3 = vadd.f32 %v1576_v27, %v3007_v23 }
 0x3bf   : > { %v1625_v9 = vadd.f32 %v1574_v33, %v3011_v30  ;;  %v3276_v33 = vld [vmem:[#allocation7_spill] sm:$0xff] }
 0x3c0   : > { %v1658_v4 = vsub.f32 %v2880_v8, %v1626_v3  ;;  %v1520_v45 = vpop.xlane.xlu1 %1519 }
 0x3c1   : > { %v1657_v6 = vsub.f32 %v2883_v10, %v1625_v9  ;;  %2337 = vlog2.f32 %v1520_v45  ;;  %v1518_v35 = vpop.xlane.xlu0 %1517 }
 0x3c2   : > { %1690 = vst [vmem:[%s3094_s16 + $0x68] sm:$0xff] %v1658_v4  ;;  %2339 = vlog2.f32 %v1518_v35  ;;  %v3277_v4 = vld [vmem:[#allocation8_spill] sm:$0xff] }
 0x3c3   : > { %v2334_v34 = vpop.eup %2333  ;;  %1689 = vst [vmem:[%s3094_s16 + $0x60] sm:$0xff] %v1657_v6 }
 0x3c4   : > { %v2336_v7 = vpop.eup %2335  ;;  %v1580_v11 = vmul.f32 0.6931472, %v2334_v34 }
 0x3c5   : > { %v1578_v56 = vmul.f32 0.6931472, %v2336_v7 }
 0x3c6   : > { %v1628_v23 = vadd.f32 %v1580_v11, %v3015_v46 }
 0x3c7   : > { %v1627_v30 = vadd.f32 %v1578_v56, %v3019_v57  ;;  %v3278_v56 = vld [vmem:[#allocation9_spill] sm:$0xff] }
 0x3c8   : > { %v1660_v8 = vsub.f32 %v2888_v12, %v1628_v23  ;;  %v1524_v50 = vpop.xlane.xlu1 %1523 }
 0x3c9   : > { %v1659_v10 = vsub.f32 %v2891_v16, %v1627_v30  ;;  %2341 = vlog2.f32 %v1524_v50  ;;  %v1522_v58 = vpop.xlane.xlu0 %1521 }
 0x3ca   : > { %1692 = vst [vmem:[%s3094_s16 + $0x78] sm:$0xff] %v1660_v8  ;;  %2343 = vlog2.f32 %v1522_v58  ;;  %v3279_v8 = vld [vmem:[#allocation10_spill] sm:$0xff] }
 0x3cb   : > { %v2338_v41 = vpop.eup %2337  ;;  %1691 = vst [vmem:[%s3094_s16 + $0x70] sm:$0xff] %v1659_v10 }
 0x3cc   : > { %v2340_v53 = vpop.eup %2339  ;;  %v1584_v43 = vmul.f32 0.6931472, %v2338_v41 }
 0x3cd   : > { %v1582_v49 = vmul.f32 0.6931472, %v2340_v53 }
 0x3ce   : > { %v1630_v46 = vadd.f32 %v1584_v43, %v3023_v17 }
 0x3cf   : > { %v1629_v57 = vadd.f32 %v1582_v49, %v3027_v20  ;;  %v3280_v49 = vld [vmem:[#allocation11_spill] sm:$0xff] }
 0x3d0   : > { %v1662_v12 = vsub.f32 %v2896_v18, %v1630_v46  ;;  %v1528_v48 = vpop.xlane.xlu1 %1527 }
 0x3d1   : > { %v1661_v16 = vsub.f32 %v2899_v15, %v1629_v57  ;;  %2345 = vlog2.f32 %v1528_v48  ;;  %v1526_v28 = vpop.xlane.xlu0 %1525 }
 0x3d2   : > { %1694 = vst [vmem:[%s3094_s16 + $0x88] sm:$0xff] %v1662_v12  ;;  %2347 = vlog2.f32 %v1526_v28  ;;  %v3281_v12 = vld [vmem:[#allocation12_spill] sm:$0xff] }
 0x3d3   : > { %v2342_v32 = vpop.eup %2341  ;;  %1693 = vst [vmem:[%s3094_s16 + $0x80] sm:$0xff] %v1661_v16 }
 0x3d4   : > { %v2344_v60 = vpop.eup %2343  ;;  %v1588_v51 = vmul.f32 0.6931472, %v2342_v32 }
 0x3d5   : > { %v1586_v62 = vmul.f32 0.6931472, %v2344_v60 }
 0x3d6   : > { %v1632_v17 = vadd.f32 %v1588_v51, %v3031_v40 }
 0x3d7   : > { %v1631_v20 = vadd.f32 %v1586_v62, %v3035_v55  ;;  %v3282_v62 = vld [vmem:[#allocation13_spill] sm:$0xff] }
 0x3d8   : > { %v1664_v18 = vsub.f32 %v2904_v21, %v1632_v17  ;;  %v1532_v31 = vpop.xlane.xlu1 %1531 }
 0x3d9   : > { %v1663_v15 = vsub.f32 %v2907_v22, %v1631_v20  ;;  %2349 = vlog2.f32 %v1532_v31  ;;  %v1530_v37 = vpop.xlane.xlu0 %1529  ;;  %v3283_v20 = vld [vmem:[#allocation14_spill] sm:$0xff] }
 0x3da   : > { %1696 = vst [vmem:[%s3094_s16 + $0x98] sm:$0xff] %v1664_v18  ;;  %2351 = vlog2.f32 %v1530_v37 }
 0x3db   : > { %v2346_v39 = vpop.eup %2345  ;;  %1695 = vst [vmem:[%s3094_s16 + $0x90] sm:$0xff] %v1663_v15 }
 0x3dc   : > { %v2348_v59 = vpop.eup %2347  ;;  %v1592_v61 = vmul.f32 0.6931472, %v2346_v39 }
 0x3dd   : > { %v1590_v44 = vmul.f32 0.6931472, %v2348_v59  ;;  %v3284_v59 = vld [vmem:[#allocation17_spill] sm:$0xff] }
 0x3de   : > { %v1634_v40 = vadd.f32 %v1592_v61, %v3039_v19  ;;  %v3285_v61 = vld [vmem:[#allocation15_spill] sm:$0xff] }
 0x3df   : > { %v1633_v55 = vadd.f32 %v1590_v44, %v3043_v25 }
 0x3e0   : > { %v1666_v21 = vsub.f32 %v3274_v13, %v1634_v40  ;;  %v1536_v0 = vpop.xlane.xlu1 %1535  ;;  %v3286_v40 = vld [vmem:[#allocation16_spill] sm:$0xff] }
 0x3e1   : > { %v1665_v22 = vsub.f32 %v3275_v63, %v1633_v55  ;;  %2353 = vlog2.f32 %v1536_v0  ;;  %v1534_v2 = vpop.xlane.xlu0 %1533 }
 0x3e2   : > { %1698 = vst [vmem:[%s3094_s16 + $0xa8] sm:$0xff] %v1666_v21  ;;  %2355 = vlog2.f32 %v1534_v2 }
 0x3e3   : > { %v2350_v52 = vpop.eup %2349  ;;  %1697 = vst [vmem:[%s3094_s16 + $0xa0] sm:$0xff] %v1665_v22 }
 0x3e4   : > { %v2352_v29 = vpop.eup %2351  ;;  %v1596_v54 = vmul.f32 0.6931472, %v2350_v52 }
 0x3e5   : > { %v1594_v27 = vmul.f32 0.6931472, %v2352_v29 }
 0x3e6   : > { %v1636_v19 = vadd.f32 %v1596_v54, %v3047_v47 }
 0x3e7   : > { %v1635_v25 = vadd.f32 %v1594_v27, %v3051_v5 }
 0x3e8   : > { %v1668_v3 = vsub.f32 %v3276_v33, %v1636_v19  ;;  %v1540_v9 = vpop.xlane.xlu1 %1539 }
 0x3e9   : > { %v1667_v45 = vsub.f32 %v3277_v4, %v1635_v25  ;;  %2357 = vlog2.f32 %v1540_v9  ;;  %v1538_v6 = vpop.xlane.xlu0 %1537 }
 0x3ea   : > { %1700 = vst [vmem:[%s3094_s16 + $0xb8] sm:$0xff] %v1668_v3  ;;  %2359 = vlog2.f32 %v1538_v6 }
 0x3eb   : > { %v2354_v35 = vpop.eup %2353  ;;  %1699 = vst [vmem:[%s3094_s16 + $0xb0] sm:$0xff] %v1667_v45 }
 0x3ec   : > { %v2356_v34 = vpop.eup %2355  ;;  %v1600_v7 = vmul.f32 0.6931472, %v2354_v35 }
 0x3ed   : > { %v1598_v11 = vmul.f32 0.6931472, %v2356_v34 }
 0x3ee   : > { %v1638_v47 = vadd.f32 %v1600_v7, %v3055_v36 }
 0x3ef   : > { %v1637_v5 = vadd.f32 %v1598_v11, %v3059_v42 }
 0x3f0   : > { %v1670_v23 = vsub.f32 %v3278_v56, %v1638_v47  ;;  %v1544_v30 = vpop.xlane.xlu1 %1543 }
 0x3f1   : > { %v1669_v50 = vsub.f32 %v3279_v8, %v1637_v5  ;;  %2361 = vlog2.f32 %v1544_v30  ;;  %v1542_v10 = vpop.xlane.xlu0 %1541 }
 0x3f2   : > { %1702 = vst [vmem:[%s3094_s16 + $0xc8] sm:$0xff] %v1670_v23  ;;  %2363 = vlog2.f32 %v1542_v10 }
 0x3f3   : > { %v2358_v58 = vpop.eup %2357  ;;  %1701 = vst [vmem:[%s3094_s16 + $0xc0] sm:$0xff] %v1669_v50 }
 0x3f4   : > { %v2360_v41 = vpop.eup %2359  ;;  %v1604_v53 = vmul.f32 0.6931472, %v2358_v58 }
 0x3f5   : > { %v1602_v43 = vmul.f32 0.6931472, %v2360_v41 }
 0x3f6   : > { %v1640_v36 = vadd.f32 %v1604_v53, %v3063_v1 }
 0x3f7   : > { %v1639_v42 = vadd.f32 %v1602_v43, %v3067_v26 }
 0x3f8   : > { %v1672_v46 = vsub.f32 %v3280_v49, %v1640_v36  ;;  %v1548_v57 = vpop.xlane.xlu1 %1547 }
 0x3f9   : > { %v1671_v48 = vsub.f32 %v3281_v12, %v1639_v42  ;;  %2365 = vlog2.f32 %v1548_v57  ;;  %v1546_v16 = vpop.xlane.xlu0 %1545 }
 0x3fa   : > { %1704 = vst [vmem:[%s3094_s16 + $0xd8] sm:$0xff] %v1672_v46  ;;  %2367 = vlog2.f32 %v1546_v16 }
 0x3fb   : > { %v2362_v28 = vpop.eup %2361  ;;  %1703 = vst [vmem:[%s3094_s16 + $0xd0] sm:$0xff] %v1671_v48 }
 0x3fc   : > { %v2364_v32 = vpop.eup %2363  ;;  %v1608_v60 = vmul.f32 0.6931472, %v2362_v28 }
 0x3fd   : > { %v1606_v1 = vmul.f32 0.6931472, %v2364_v32 }
 0x3fe   : > { %v1642_v26 = vadd.f32 %v1608_v60, %v3071_v38 }
 0x3ff   : > { %v1641_v51 = vadd.f32 %v1606_v1, %v3075_v24 }
 0x400   : > { %v1674_v17 = vsub.f32 %v3282_v62, %v1642_v26 }
 0x401   : > { %v1673_v18 = vsub.f32 %v3283_v20, %v1641_v51 }
 0x402   : > { %1706 = vst [vmem:[%s3094_s16 + $0xe8] sm:$0xff] %v1674_v17 }
 0x403   : > { %v2366_v31 = vpop.eup %2365  ;;  %1705 = vst [vmem:[%s3094_s16 + $0xe0] sm:$0xff] %v1673_v18 }
 0x404   : > { %v2368_v15 = vpop.eup %2367  ;;  %v1612_v37 = vmul.f32 0.6931472, %v2366_v31 }
 0x405   : > { %v1610_v39 = vmul.f32 0.6931472, %v2368_v15 }
 0x406   : > { %v1644_v38 = vadd.f32 %v1612_v37, %v3079_v14 }
 0x407   : > { %v1643_v24 = vadd.f32 %v1610_v39, %v3284_v59 }
 0x408   : > { %v1676_v44 = vsub.f32 %v3285_v61, %v1644_v38 }
 0x409   : > { %v1675_v55 = vsub.f32 %v3286_v40, %v1643_v24 }
 0x40a   : > { %1708 = vst [vmem:[%s3094_s16 + $0xf8] sm:$0xff] %v1676_v44 }
 0x40b   : > { %1707 = vst [vmem:[%s3094_s16 + $0xf0] sm:$0xff] %v1675_v55 }
 0x40c   : > { %2382 = shalt.err (!%p2379_p3)
}
 0x40d   : > { %s2383_s10 = scalar_lea.hbm %s3190_s30, 4096  ;;  %s2387_s14 = scalar_lea.hbm %s3245_s5, 8192 }
 0x40e   : > { %p2384_p4 = scmp.ne.s32.totalorder %s3190_s30, %s2383_s10  ;;  %p2388_p9 = scmp.lt.u32.totalorder %s3190_s30, %s3245_s5 }
 0x40f   : > { %p2389_p10 = scmp.lt.u32.totalorder %s2387_s14, %s2383_s10  ;;  %p2391_p12 = scmp.lt.u32.totalorder %s2383_s10, %s3190_s30 }
 0x410   : > { %p2385_p7 = pnand %p2384_p4, %p2507_p5 }
 0x411   : > { %p2390_p11 = por %p2389_p10, %p2388_p9 }
 0x412   : > { %p2386_p8 = pneg %p2385_p7 }
 0x413   : > { %p2392_p13 = por %p2391_p12, %p2390_p11 }
 0x415   : > { %p2393_p0 = pnand %p2392_p13, %p2386_p8 }
 0x417   : > { %2396 = shalt.err (!%p2393_p0)
}
 0x418   : > { %s2437_s16 = smov 128   ;;  %s2438_s17 = smov 8  }
 0x419   : > { %2192 = dma.vmem_to_hbm [thread:$0]  (%p2507_p5), %s3192_s23, 4096, %s3190_s30, %s3199_s22, %s2437_s16, %s2437_s16, %s2438_s17  }
 0x41a PF: > { %p2198_p1 = scmp.ge.s32.totalorder %s2431_s21, 2  ;;  %s1738_s25 = sand.u32 1, %s2419_s18  }
 0x41b   : > { %s1739_s26 = scalar_lea.sflag [#allocation3], %s1738_s25 }
 0x41c   : > { %p2195_p2 = pnand %p2198_p1, %p2511_p6 }
 0x41e   : > { %2414 = dma.done.wait (!%p2195_p2), %s1739_s26, 4096  }
 0x41f   : > { %2416 = vsyncadd (!%p2195_p2), %s1739_s26, 4294963200  ;;  %p15_p3 = scmp.ge.s32.totalorder %s2494_s24, 4   ;;  %s3287_s18 = smov %s2423_s19 }
 0x420   : > { %s3288_s19 = smov %s2427_s20  ;;  %s3289_s20 = smov %s2505_s27 }
 0x421   : > { %s3290_s21 = smov %s2494_s24  ;;  %17 = sbr.rel (!%p15_p3) target bundleno = 3 (0x3), region = 75 }
 0x428   :  { %1744 = vsyncpa [#allocation3], 1 }
 0x429   :  { %1746 = vsyncpa [#allocation3 + $0x1], 1 }

</bundles_post_ra>
